<compile_context>
chip_gen: v7x
topology: tpu7x:2x2x1
jax: 0.10.0
libtpu: 0.0.40
codegen_flags: <defaults>
</compile_context>

<pallas_src>
import functools

import jax
import jax.numpy as jnp
from jax.experimental import pallas as pl
from jax.experimental.pallas import tpu as pltpu

NEG_SLOPE = 0.2       # PyG GATConv default LeakyReLU slope
MASK_VAL = -1e9       # folded adjacency mask (representable in bf16)
OUT_PAD = 128         # lane-dense padded output width


def _round_up(x, m):
    return (x + m - 1) // m * m


def _vmem_limit_bytes():
    try:
        cap = pltpu.get_tpu_info().vmem_capacity_bytes
    except Exception:
        cap = 64 * 1024 * 1024
    return int(max(32 * 1024 * 1024, min(100 * 1024 * 1024, cap - 4 * 1024 * 1024)))


def _vmem():
    return pl.BlockSpec(memory_space=pltpu.MemorySpace.VMEM)


def _bdot(a, b):
    """MXU matmul: bf16 inputs (weights pre-cast), f32 accumulation."""
    return jnp.dot(a.astype(jnp.bfloat16), b.astype(jnp.bfloat16),
                   preferred_element_type=jnp.float32)


# ----------------------------------------------------------------------------
# Kernel A: molecule embedding MLP + GAT-layer-1 projections (whole graph)
# ----------------------------------------------------------------------------

def proj_kernel(x_ref, w1_ref, b1_ref, w2_ref, b2_ref, g1w_ref, att1_ref,
                wh1_ref, adst_ref, asrc_t_ref, *, heads):
    # 1. molecule embedding: Linear -> ReLU -> Linear  (input slab already packed)
    h = jnp.maximum(_bdot(x_ref[...], w1_ref[...]) + b1_ref[...], 0.0)
    emb = _bdot(h, w2_ref[...]) + b2_ref[...]                     # [N, emb] f32
    # 2. GAT1 per-head linear projection (one batched MXU push)
    wh = _bdot(emb, g1w_ref[...])                                 # [N, heads*dh1]
    wh1_ref[...] = wh.astype(wh1_ref.dtype)
    # 3. attention scalars via block-diagonal attention vectors: [N, 2*heads]
    a = _bdot(wh, att1_ref[...])
    adst_ref[...] = a[:, heads:]                                  # [N, heads]
    # a_src transposed ONCE here so the tiled attention kernel needs no XLU transposes
    asrc_t_ref[...] = a[:, :heads].T                              # [heads, N]


# ----------------------------------------------------------------------------
# Kernel B: GAT layer 1 attention + ELU, tiled over destination-row blocks
# ----------------------------------------------------------------------------

def gat1_kernel(e_ref, adst_ref, asrc_ref, wh_ref, g1b_ref, h1_ref, *, heads, dh):
    outs = []
    for h in range(heads):
        # logits[dst, src]; adjacency mask (-1e9) folded into e; add done in f32
        logits = (adst_ref[:, h:h + 1] + asrc_ref[h:h + 1, :]
                  + e_ref[h].astype(jnp.float32))
        logits = jnp.where(logits > 0, logits, NEG_SLOPE * logits)    # LeakyReLU
        m = jnp.max(logits, axis=-1, keepdims=True)
        p = jnp.exp(logits - m)
        inv = pl.reciprocal(jnp.sum(p, axis=-1, keepdims=True), approx=True)
        outs.append(_bdot(p * inv, wh_ref[:, h * dh:(h + 1) * dh]))   # softmax @ Wh
    # single full-width lane-dense store (no per-head masked vst), bias + ELU
    v = jnp.concatenate(outs, axis=-1) + g1b_ref[...]
    h1_ref[...] = jnp.where(v > 0, v,
                            jnp.exp(jnp.minimum(v, 0.0)) - 1.0).astype(h1_ref.dtype)


# ----------------------------------------------------------------------------
# Kernel C: GAT layer 2 (1 head) + mean pool + multitask FNN (whole graph)
# ----------------------------------------------------------------------------

def tail_kernel(h1_ref, e2_ref, g2w_ref, att2_ref, g2b_ref, pool_ref, feats_ref,
                wsg_ref, wsf_ref, bs_ref, whm_ref, bhm_ref, wo_ref, bo_ref, o_ref):
    h1 = h1_ref[...]                                               # bf16 [N, heads*dh1]
    wh2 = _bdot(h1, g2w_ref[...])                                  # [N, dh2] f32
    a2 = _bdot(wh2, att2_ref[...])                                 # [N, 2]
    logits = a2[:, 1:2] + a2[:, 0:1].T + e2_ref[...].astype(jnp.float32)
    logits = jnp.where(logits > 0, logits, NEG_SLOPE * logits)
    m = jnp.max(logits, axis=-1, keepdims=True)
    p = jnp.exp(logits - m)
    inv = pl.reciprocal(jnp.sum(p, axis=-1, keepdims=True), approx=True)
    h2 = _bdot(p * inv, wh2) + g2b_ref[...]                        # [N, dh2]
    # per-polymer mean pool kept in f32 (tiny matmul, preserves accuracy)
    pooled = jnp.dot(pool_ref[...], h2, preferred_element_type=jnp.float32)
    shared = jnp.maximum(_bdot(pooled, wsg_ref[...])
                         + _bdot(feats_ref[...], wsf_ref[...]) + bs_ref[...], 0.0)
    hcat = jnp.maximum(_bdot(shared, whm_ref[...]) + bhm_ref[...], 0.0)
    # lane-dense [P, 128] output (cols 0,1 hold the two tasks; sliced outside)
    o_ref[...] = _bdot(hcat, wo_ref[...]) + bo_ref[...]


# ----------------------------------------------------------------------------
# JAX glue: graph structure + parameter packing (runs under jit, tiny)
# ----------------------------------------------------------------------------

def _att_block_diag(a_src, a_dst, heads, dh):
    """[dh, heads] x2 -> [heads*dh, 2*heads]; cols [0:heads]=src, [heads:]=dst."""
    bd = jnp.zeros((heads * dh, 2 * heads), jnp.float32)
    for h in range(heads):
        bd = bd.at[h * dh:(h + 1) * dh, h].set(a_src[:, h])
        bd = bd.at[h * dh:(h + 1) * dh, heads + h].set(a_dst[:, h])
    return bd


def _dense_edge_logit_bias(edge_attr, src, dst, adj, w_e, att_e, n, heads, dh):
    """Dense per-(head, dst, src) edge attention term with the adjacency mask folded
    in: alpha_e on edges, 0 on self loops, -1e9 on non-edges. Stored in bf16."""
    e_proj = (edge_attr @ w_e).reshape(-1, heads, dh)           # [E, heads, dh]
    alpha_e = jnp.sum(e_proj * att_e[None], axis=-1)            # [E, heads]
    base = jnp.where(adj > 0, 0.0, jnp.float32(MASK_VAL))       # [N, N]
    dense = jnp.broadcast_to(base[None], (heads, n, n))
    # TODO(synk): duplicate (dst, src) parallel edges are deduped by this dense
    # scatter, unlike PyG's per-edge softmax over parallel edges.
    dense = dense.at[:, dst, src].set(alpha_e.T)
    return dense.astype(jnp.bfloat16)                           # bf16: halves HBM bytes


def polymer_gnn_forward(params, mpnn_out, full_rdkit, polymer_feats,
                        edge_index, edge_attr, polymer_mapping, *,
                        num_polymers, heads, gnn_hid, gnn_out):
    bf = jnp.bfloat16
    n = mpnn_out.shape[0]
    k_in = mpnn_out.shape[1] + full_rdkit.shape[1]
    src, dst = edge_index[0], edge_index[1]

    # ---- padding geometry: dst-row tile size + lane-dense input slab width
    tm = _round_up(n, 8) if n <= 128 else 128
    n_pad = _round_up(n, tm)
    n_tiles = n_pad // tm
    k1 = _round_up(k_in, 128)
    hd1 = heads * gnn_hid

    # ---- packed lane-dense input slab: concat(mpnn, rdkit), zero pad, bf16
    x_in = jnp.concatenate([mpnn_out, full_rdkit], axis=1)
    x_in = jnp.pad(x_in, ((0, n_pad - n), (0, k1 - k_in))).astype(bf)

    # ---- dense adjacency (row = dst, col = src) with self loops, padded N
    adj = jnp.zeros((n_pad, n_pad), jnp.float32).at[dst, src].set(1.0)
    adj = jnp.maximum(adj, jnp.eye(n_pad, dtype=jnp.float32))
    # TODO(synk): PyG GATConv fills self-loop edge_attr with the mean edge feature;
    # self-loop edge attention terms here are zero.
    e1 = _dense_edge_logit_bias(edge_attr, src, dst, adj,
                                params["g1_we"], params["g1_ae"], n_pad, heads, gnn_hid)
    e2 = _dense_edge_logit_bias(edge_attr, src, dst, adj,
                                params["g2_we"], params["g2_ae"], n_pad, 1, gnn_out)[0]

    # ---- mean-pool matrix per polymer (f32, zero columns for padded nodes)
    onehot = (polymer_mapping[None, :] ==
              jnp.arange(num_polymers, dtype=polymer_mapping.dtype)[:, None]
              ).astype(jnp.float32)                                     # [P, N]
    counts = jnp.maximum(jnp.sum(onehot, axis=1, keepdims=True), 1.0)
    pool = jnp.pad(onehot / counts, ((0, 0), (0, n_pad - n)))           # [P, N_pad]

    # ---- parameter packing: bf16 weights, block-diag attention, merged FNN heads
    w1 = jnp.pad(jnp.concatenate([params["emb_w1_mpnn"], params["emb_w1_rdkit"]],
                                 axis=0), ((0, k1 - k_in), (0, 0))).astype(bf)
    att1 = _att_block_diag(params["g1_asrc"], params["g1_adst"], heads, gnn_hid).astype(bf)
    att2 = _att_block_diag(params["g2_asrc"], params["g2_adst"], 1, gnn_out).astype(bf)
    fnn_hid = params["wh1"].shape[1]
    whm = jnp.concatenate([params["wh1"], params["wh2"]], axis=1).astype(bf)   # [S, 2F]
    bhm = jnp.concatenate([params["bh1"], params["bh2"]], axis=1)              # [1, 2F]
    wobd = jnp.zeros((2 * fnn_hid, OUT_PAD), jnp.float32)
    wobd = wobd.at[:fnn_hid, 0:1].set(params["wo1"])
    wobd = wobd.at[fnn_hid:, 1:2].set(params["wo2"]).astype(bf)                # block-diag
    bom = jnp.zeros((1, OUT_PAD), jnp.float32)
    bom = bom.at[:, 0:1].set(params["bo1"]).at[:, 1:2].set(params["bo2"])

    vlim = _vmem_limit_bytes()

    # ---- stage A: molecule embedding MLP + GAT1 projections (single block)
    wh1, adst, asrc_t = pl.pallas_call(
        functools.partial(proj_kernel, heads=heads),
        out_shape=(jax.ShapeDtypeStruct((n_pad, hd1), bf),
                   jax.ShapeDtypeStruct((n_pad, heads), jnp.float32),
                   jax.ShapeDtypeStruct((heads, n_pad), jnp.float32)),
        in_specs=[_vmem()] * 7,
        out_specs=(_vmem(), _vmem(), _vmem()),
        compiler_params=pltpu.CompilerParams(vmem_limit_bytes=vlim),
    )(x_in, w1, params["emb_b1"], params["emb_w2"].astype(bf), params["emb_b2"],
      params["g1_w"].astype(bf), att1)

    # ---- stage B: tiled GAT1 attention (grid over dst-row tiles, megacore-parallel)
    cost_b = pl.CostEstimate(
        flops=int(2 * heads * n_pad * n_pad * gnn_hid + 8 * heads * n_pad * n_pad),
        transcendentals=int(heads * n_pad * n_pad),
        bytes_accessed=int(2 * heads * n_pad * n_pad + 4 * n_pad * hd1
                           + 4 * n_pad * 3 * heads))
    h1 = pl.pallas_call(
        functools.partial(gat1_kernel, heads=heads, dh=gnn_hid),
        out_shape=jax.ShapeDtypeStruct((n_pad, hd1), bf),
        grid=(n_tiles,),
        in_specs=[
            pl.BlockSpec((heads, tm, n_pad), lambda i: (0, i, 0)),   # e1 dst-row tile
            pl.BlockSpec((tm, heads), lambda i: (i, 0)),             # a_dst tile
            pl.BlockSpec((heads, n_pad), lambda i: (0, 0)),          # a_src^T (full)
            pl.BlockSpec((n_pad, hd1), lambda i: (0, 0)),            # Wh (full, bf16)
            pl.BlockSpec((1, hd1), lambda i: (0, 0)),                # GAT1 bias
        ],
        out_specs=pl.BlockSpec((tm, hd1), lambda i: (i, 0)),
        compiler_params=pltpu.CompilerParams(
            dimension_semantics=("parallel",), vmem_limit_bytes=vlim),
        cost_estimate=cost_b,
    )(e1, adst, asrc_t, wh1, params["g1_b"])

    # ---- stage C: GAT layer 2 + mean pool + multitask FNN
    cost_c = pl.CostEstimate(
        flops=int(2 * n_pad * n_pad * gnn_out + 2 * n_pad * hd1 * gnn_out
                  + 2 * num_polymers * n_pad * gnn_out + 8 * n_pad * n_pad),
        transcendentals=int(n_pad * n_pad + n_pad),
        bytes_accessed=int(2 * n_pad * n_pad + 2 * n_pad * hd1
                           + 4 * num_polymers * n_pad))
    out = pl.pallas_call(
        tail_kernel,
        out_shape=jax.ShapeDtypeStruct((num_polymers, OUT_PAD), jnp.float32),
        in_specs=[_vmem()] * 14,
        out_specs=_vmem(),
        compiler_params=pltpu.CompilerParams(vmem_limit_bytes=vlim),
        cost_estimate=cost_c,
    )(h1, e2, params["g2_w"].astype(bf), att2, params["g2_b"], pool, polymer_feats,
      params["ws_g"].astype(bf), params["ws_f"].astype(bf), params["bs"],
      whm, bhm, wobd, bom)

    return out[:, :2]                                               # [P, 2]


# ----------------------------------------------------------------------------
# Parameter initialization (deterministic, synthetic)
# ----------------------------------------------------------------------------

def init_params(key, *, mpnn_dim, n_rdkit, mol_hidden, emb_dim,
                gnn_hid, gnn_out, heads, edge_dim, shared_dim, fnn_hid):
    ks = jax.random.split(key, 32)
    it = iter(range(32))

    def nrm(shape, scale=0.1):
        return (scale * jax.random.normal(ks[next(it)], shape)).astype(jnp.float32)

    return {
        # molecule embedding MLP (w1 split: mpnn part + rdkit part)
        "emb_w1_mpnn": nrm((mpnn_dim, mol_hidden)),
        "emb_w1_rdkit": nrm((n_rdkit, mol_hidden)),
        "emb_b1": nrm((1, mol_hidden)),
        "emb_w2": nrm((mol_hidden, emb_dim)),
        "emb_b2": nrm((1, emb_dim)),
        # GAT layer 1 (heads, concat)
        "g1_w": nrm((emb_dim, heads * gnn_hid)),
        "g1_asrc": nrm((gnn_hid, heads)),
        "g1_adst": nrm((gnn_hid, heads)),
        "g1_we": nrm((edge_dim, heads * gnn_hid)),
        "g1_ae": nrm((heads, gnn_hid)),
        "g1_b": nrm((1, heads * gnn_hid)),
        # GAT layer 2 (1 head)
        "g2_w": nrm((heads * gnn_hid, gnn_out)),
        "g2_asrc": nrm((gnn_out, 1)),
        "g2_adst": nrm((gnn_out, 1)),
        "g2_we": nrm((edge_dim, gnn_out)),
        "g2_ae": nrm((1, gnn_out)),
        "g2_b": nrm((1, gnn_out)),
        # multitask FNN
        "ws_g": nrm((gnn_out, shared_dim)),
        "ws_f": nrm((2, shared_dim)),
        "bs": nrm((1, shared_dim)),
        "wh1": nrm((shared_dim, fnn_hid)),
        "bh1": nrm((1, fnn_hid)),
        "wo1": nrm((fnn_hid, 1)),
        "bo1": nrm((1, 1)),
        "wh2": nrm((shared_dim, fnn_hid)),
        "bh2": nrm((1, fnn_hid)),
        "wo2": nrm((fnn_hid, 1)),
        "bo2": nrm((1, 1)),
    }


# ----------------------------------------------------------------------------
# Demo
# ----------------------------------------------------------------------------

if __name__ == "__main__":
    # small shapes consistent with the module (scaled-down dims)
    N_MOL, MPNN_DIM, N_RDKIT = 8, 32, 7
    MOL_HIDDEN, EMB_DIM = 64, 32
    GNN_HID, GNN_OUT, HEADS = 16, 16, 4
    EDGE_DIM = 2
    N_POLY = 2
    SHARED_DIM, FNN_HID = 32, 32

    key = jax.random.PRNGKey(0)
    kp, k1, k2, k3, k4 = jax.random.split(key, 5)

    params = init_params(kp, mpnn_dim=MPNN_DIM, n_rdkit=N_RDKIT,
                         mol_hidden=MOL_HIDDEN, emb_dim=EMB_DIM,
                         gnn_hid=GNN_HID, gnn_out=GNN_OUT, heads=HEADS,
                         edge_dim=EDGE_DIM, shared_dim=SHARED_DIM, fnn_hid=FNN_HID)

    mpnn_out = jax.random.normal(k1, (N_MOL, MPNN_DIM), jnp.float32)
    full_rdkit = jax.random.normal(k2, (N_MOL, N_RDKIT), jnp.float32)
    polymer_feats = jax.random.normal(k3, (N_POLY, 2), jnp.float32)
    # deterministic, duplicate-free edge list (PyG convention: row0 = src, row1 = dst)
    edge_src = jnp.array([0, 1, 2, 3, 4, 5, 6, 7, 0, 2, 4, 6], jnp.int32)
    edge_dst = jnp.array([1, 2, 3, 0, 5, 6, 7, 4, 2, 0, 6, 4], jnp.int32)
    edge_index = jnp.stack([edge_src, edge_dst], axis=0)
    edge_attr = jax.random.normal(k4, (edge_src.shape[0], EDGE_DIM), jnp.float32)
    polymer_mapping = jnp.array([0, 0, 0, 0, 1, 1, 1, 1], jnp.int32)

    fwd = jax.jit(functools.partial(polymer_gnn_forward,
                                    num_polymers=N_POLY, heads=HEADS,
                                    gnn_hid=GNN_HID, gnn_out=GNN_OUT))
    preds = fwd(params, mpnn_out, full_rdkit, polymer_feats,
                edge_index, edge_attr, polymer_mapping)
    preds = jax.block_until_ready(preds)
    assert preds.shape == (N_POLY, 2) and preds.dtype == jnp.float32
    assert bool(jnp.all(jnp.isfinite(preds)))
    print("KERNEL_OK")
</pallas_src>

<mosaic_0001>
module attributes {stable_mosaic.version = 11 : i64} {
  func.func @proj_kernel(%arg0: memref<8x128xbf16, #tpu.memory_space<vmem>>, %arg1: memref<128x64xbf16, #tpu.memory_space<vmem>>, %arg2: memref<1x64xf32, #tpu.memory_space<vmem>>, %arg3: memref<64x32xbf16, #tpu.memory_space<vmem>>, %arg4: memref<1x32xf32, #tpu.memory_space<vmem>>, %arg5: memref<32x64xbf16, #tpu.memory_space<vmem>>, %arg6: memref<64x8xbf16, #tpu.memory_space<vmem>>, %arg7: memref<8x64xbf16, #tpu.memory_space<vmem>>, %arg8: memref<8x4xf32, #tpu.memory_space<vmem>>, %arg9: memref<4x8xf32, #tpu.memory_space<vmem>>) attributes {dimension_semantics = [], scalar_prefetch = 0 : i64, scratch_operands = 0 : i64, tpu.core_type = #tpu.core_type<tc>} {
    %c0 = arith.constant 0 : index
    %c0_0 = arith.constant 0 : index
    %0 = vector.load %arg0[%c0, %c0_0] : memref<8x128xbf16, #tpu.memory_space<vmem>>, vector<8x128xbf16>
    %c0_1 = arith.constant 0 : index
    %c0_2 = arith.constant 0 : index
    %1 = vector.load %arg1[%c0_1, %c0_2] : memref<128x64xbf16, #tpu.memory_space<vmem>>, vector<128x64xbf16>
    %cst = arith.constant dense<0.000000e+00> : vector<8x64xf32>
    %2 = tpu.matmul %0, %1, %cst {dimension_numbers = #tpu.dot_dimension_numbers<[1], [0], [0], [1], [0, 0, 1, 1], [], []>} : vector<8x128xbf16>, vector<128x64xbf16>, vector<8x64xf32> -> vector<8x64xf32>
    %c0_3 = arith.constant 0 : index
    %c0_4 = arith.constant 0 : index
    %3 = vector.load %arg2[%c0_3, %c0_4] : memref<1x64xf32, #tpu.memory_space<vmem>>, vector<1x64xf32>
    %4 = vector.broadcast %3 : vector<1x64xf32> to vector<8x64xf32>
    %5 = arith.addf %2, %4 : vector<8x64xf32>
    %cst_5 = arith.constant 0.000000e+00 : f32
    %6 = vector.broadcast %cst_5 : f32 to vector<8x64xf32>
    %7 = arith.maximumf %5, %6 : vector<8x64xf32>
    %c0_6 = arith.constant 0 : index
    %c0_7 = arith.constant 0 : index
    %8 = vector.load %arg3[%c0_6, %c0_7] : memref<64x32xbf16, #tpu.memory_space<vmem>>, vector<64x32xbf16>
    %9 = arith.truncf %7 : vector<8x64xf32> to vector<8x64xbf16>
    %cst_8 = arith.constant dense<0.000000e+00> : vector<8x32xf32>
    %10 = tpu.matmul %9, %8, %cst_8 {dimension_numbers = #tpu.dot_dimension_numbers<[1], [0], [0], [1], [0, 0, 1, 1], [], []>} : vector<8x64xbf16>, vector<64x32xbf16>, vector<8x32xf32> -> vector<8x32xf32>
    %c0_9 = arith.constant 0 : index
    %c0_10 = arith.constant 0 : index
    %11 = vector.load %arg4[%c0_9, %c0_10] : memref<1x32xf32, #tpu.memory_space<vmem>>, vector<1x32xf32>
    %12 = vector.broadcast %11 : vector<1x32xf32> to vector<8x32xf32>
    %13 = arith.addf %10, %12 : vector<8x32xf32>
    %c0_11 = arith.constant 0 : index
    %c0_12 = arith.constant 0 : index
    %14 = vector.load %arg5[%c0_11, %c0_12] : memref<32x64xbf16, #tpu.memory_space<vmem>>, vector<32x64xbf16>
    %15 = arith.truncf %13 : vector<8x32xf32> to vector<8x32xbf16>
    %cst_13 = arith.constant dense<0.000000e+00> : vector<8x64xf32>
    %16 = tpu.matmul %15, %14, %cst_13 {dimension_numbers = #tpu.dot_dimension_numbers<[1], [0], [0], [1], [0, 0, 1, 1], [], []>} : vector<8x32xbf16>, vector<32x64xbf16>, vector<8x64xf32> -> vector<8x64xf32>
    %17 = arith.truncf %16 : vector<8x64xf32> to vector<8x64xbf16>
    %c0_14 = arith.constant 0 : index
    %c0_15 = arith.constant 0 : index
    %18 = vector.load %arg7[%c0_14, %c0_15] : memref<8x64xbf16, #tpu.memory_space<vmem>>, vector<8x64xbf16>
    tpu.vector_store %arg7[%c0_14, %c0_15], %17 {strides = array<i32>} : memref<8x64xbf16, #tpu.memory_space<vmem>>, vector<8x64xbf16>,
    %c0_16 = arith.constant 0 : index
    %c0_17 = arith.constant 0 : index
    %19 = vector.load %arg6[%c0_16, %c0_17] : memref<64x8xbf16, #tpu.memory_space<vmem>>, vector<64x8xbf16>
    %20 = arith.truncf %16 : vector<8x64xf32> to vector<8x64xbf16>
    %cst_18 = arith.constant dense<0.000000e+00> : vector<8x8xf32>
    %21 = tpu.matmul %20, %19, %cst_18 {dimension_numbers = #tpu.dot_dimension_numbers<[1], [0], [0], [1], [0, 0, 1, 1], [], []>} : vector<8x64xbf16>, vector<64x8xbf16>, vector<8x8xf32> -> vector<8x8xf32>
    %22 = vector.extract_strided_slice %21 {offsets = [0, 4], sizes = [8, 4], strides = [1, 1]} : vector<8x8xf32> to vector<8x4xf32>
    %c0_19 = arith.constant 0 : index
    %c0_20 = arith.constant 0 : index
    %23 = vector.load %arg8[%c0_19, %c0_20] : memref<8x4xf32, #tpu.memory_space<vmem>>, vector<8x4xf32>
    tpu.vector_store %arg8[%c0_19, %c0_20], %22 {strides = array<i32>} : memref<8x4xf32, #tpu.memory_space<vmem>>, vector<8x4xf32>,
    %24 = vector.extract_strided_slice %21 {offsets = [0, 0], sizes = [8, 4], strides = [1, 1]} : vector<8x8xf32> to vector<8x4xf32>
    %25 = tpu.transpose %24, [1, 0] : vector<8x4xf32> -> vector<4x8xf32>
    %c0_21 = arith.constant 0 : index
    %c0_22 = arith.constant 0 : index
    %26 = vector.load %arg9[%c0_21, %c0_22] : memref<4x8xf32, #tpu.memory_space<vmem>>, vector<4x8xf32>
    tpu.vector_store %arg9[%c0_21, %c0_22], %25 {strides = array<i32>} : memref<4x8xf32, #tpu.memory_space<vmem>>, vector<4x8xf32>,
    return
  }
}

module attributes {stable_mosaic.version = 11 : i64} {
  func.func @gat1_kernel(%arg0: i32, %arg1: memref<4x8x8xbf16, #tpu.memory_space<vmem>>, %arg2: memref<8x4xf32, #tpu.memory_space<vmem>>, %arg3: memref<4x8xf32, #tpu.memory_space<vmem>>, %arg4: memref<8x64xbf16, #tpu.memory_space<vmem>>, %arg5: memref<1x64xf32, #tpu.memory_space<vmem>>, %arg6: memref<8x64xbf16, #tpu.memory_space<vmem>>) attributes {dimension_semantics = [#tpu.dimension_semantics<parallel>], iteration_bounds = array<i64: 1>, scalar_prefetch = 0 : i64, scratch_operands = 0 : i64, tpu.core_type = #tpu.core_type<tc>, window_params = [{transform_indices = @transform_0, window_bounds = array<i64: 4, 8, 8>}, {transform_indices = @transform_1, window_bounds = array<i64: 8, 4>}, {pipeline_mode = #tpu.pipeline_mode<synchronous>, transform_indices = @transform_2, window_bounds = array<i64: 4, 8>}, {pipeline_mode = #tpu.pipeline_mode<synchronous>, transform_indices = @transform_3, window_bounds = array<i64: 8, 64>}, {pipeline_mode = #tpu.pipeline_mode<synchronous>, transform_indices = @transform_4, window_bounds = array<i64: 1, 64>}, {transform_indices = @transform_5, window_bounds = array<i64: 8, 64>}]} {
    %c0 = arith.constant 0 : index
    %c0_0 = arith.constant 0 : index
    %0 = vector.load %arg2[%c0, %c0_0] : memref<8x4xf32, #tpu.memory_space<vmem>>, vector<8x1xf32>
    %c0_1 = arith.constant 0 : index
    %c0_2 = arith.constant 0 : index
    %1 = vector.load %arg3[%c0_1, %c0_2] : memref<4x8xf32, #tpu.memory_space<vmem>>, vector<1x8xf32>
    %2 = vector.broadcast %0 : vector<8x1xf32> to vector<8x8xf32>
    %3 = vector.broadcast %1 : vector<1x8xf32> to vector<8x8xf32>
    %4 = arith.addf %2, %3 : vector<8x8xf32>
    %c0_3 = arith.constant 0 : index
    %c0_4 = arith.constant 0 : index
    %c0_5 = arith.constant 0 : index
    %5 = vector.load %arg1[%c0_3, %c0_4, %c0_5] : memref<4x8x8xbf16, #tpu.memory_space<vmem>>, vector<1x8x8xbf16>
    %6 = vector.shape_cast %5 : vector<1x8x8xbf16> to vector<8x8xbf16>
    %7 = arith.extf %6 : vector<8x8xbf16> to vector<8x8xf32>
    %8 = arith.addf %4, %7 : vector<8x8xf32>
    %cst = arith.constant 0.000000e+00 : f32
    %9 = vector.broadcast %cst : f32 to vector<8x8xf32>
    %10 = arith.cmpf ogt, %8, %9 : vector<8x8xf32>
    %cst_6 = arith.constant 2.000000e-01 : f32
    %11 = vector.broadcast %cst_6 : f32 to vector<8x8xf32>
    %12 = arith.mulf %11, %8 : vector<8x8xf32>
    %13 = arith.select %10, %8, %12 : vector<8x8xi1>, vector<8x8xf32>
    %cst_7 = arith.constant dense<0xFF800000> : vector<8xf32>
    %14 = vector.multi_reduction <maximumf>, %13, %cst_7 [1] : vector<8x8xf32> to vector<8xf32>
    %15 = vector.shape_cast %14 : vector<8xf32> to vector<8x1xf32>
    %16 = vector.broadcast %15 : vector<8x1xf32> to vector<8x8xf32>
    %17 = arith.subf %13, %16 : vector<8x8xf32>
    %18 = math.exp %17 : vector<8x8xf32>
    %cst_8 = arith.constant dense<0.000000e+00> : vector<8xf32>
    %19 = vector.multi_reduction <add>, %18, %cst_8 [1] : vector<8x8xf32> to vector<8xf32>
    %20 = vector.shape_cast %19 : vector<8xf32> to vector<8x1xf32>
    %21 = tpu.reciprocal %20 {approx = true} : vector<8x1xf32> -> vector<8x1xf32>
    %22 = vector.broadcast %21 : vector<8x1xf32> to vector<8x8xf32>
    %23 = arith.mulf %18, %22 : vector<8x8xf32>
    %c0_9 = arith.constant 0 : index
    %c0_10 = arith.constant 0 : index
    %24 = vector.load %arg4[%c0_9, %c0_10] : memref<8x64xbf16, #tpu.memory_space<vmem>>, vector<8x16xbf16>
    %25 = arith.truncf %23 : vector<8x8xf32> to vector<8x8xbf16>
    %cst_11 = arith.constant dense<0.000000e+00> : vector<8x16xf32>
    %26 = tpu.matmul %25, %24, %cst_11 {dimension_numbers = #tpu.dot_dimension_numbers<[1], [0], [0], [1], [0, 0, 1, 1], [], []>} : vector<8x8xbf16>, vector<8x16xbf16>, vector<8x16xf32> -> vector<8x16xf32>
    %c0_12 = arith.constant 0 : index
    %c1 = arith.constant 1 : index
    %27 = vector.load %arg2[%c0_12, %c1] : memref<8x4xf32, #tpu.memory_space<vmem>>, vector<8x1xf32>
    %c1_13 = arith.constant 1 : index
    %c0_14 = arith.constant 0 : index
    %28 = vector.load %arg3[%c1_13, %c0_14] : memref<4x8xf32, #tpu.memory_space<vmem>>, vector<1x8xf32>
    %29 = vector.broadcast %27 : vector<8x1xf32> to vector<8x8xf32>
    %30 = vector.broadcast %28 : vector<1x8xf32> to vector<8x8xf32>
    %31 = arith.addf %29, %30 : vector<8x8xf32>
    %c1_15 = arith.constant 1 : index
    %c0_16 = arith.constant 0 : index
    %c0_17 = arith.constant 0 : index
    %32 = vector.load %arg1[%c1_15, %c0_16, %c0_17] : memref<4x8x8xbf16, #tpu.memory_space<vmem>>, vector<1x8x8xbf16>
    %33 = vector.shape_cast %32 : vector<1x8x8xbf16> to vector<8x8xbf16>
    %34 = arith.extf %33 : vector<8x8xbf16> to vector<8x8xf32>
    %35 = arith.addf %31, %34 : vector<8x8xf32>
    %cst_18 = arith.constant 0.000000e+00 : f32
    %36 = vector.broadcast %cst_18 : f32 to vector<8x8xf32>
    %37 = arith.cmpf ogt, %35, %36 : vector<8x8xf32>
    %cst_19 = arith.constant 2.000000e-01 : f32
    %38 = vector.broadcast %cst_19 : f32 to vector<8x8xf32>
    %39 = arith.mulf %38, %35 : vector<8x8xf32>
    %40 = arith.select %37, %35, %39 : vector<8x8xi1>, vector<8x8xf32>
    %cst_20 = arith.constant dense<0xFF800000> : vector<8xf32>
    %41 = vector.multi_reduction <maximumf>, %40, %cst_20 [1] : vector<8x8xf32> to vector<8xf32>
    %42 = vector.shape_cast %41 : vector<8xf32> to vector<8x1xf32>
    %43 = vector.broadcast %42 : vector<8x1xf32> to vector<8x8xf32>
    %44 = arith.subf %40, %43 : vector<8x8xf32>
    %45 = math.exp %44 : vector<8x8xf32>
    %cst_21 = arith.constant dense<0.000000e+00> : vector<8xf32>
    %46 = vector.multi_reduction <add>, %45, %cst_21 [1] : vector<8x8xf32> to vector<8xf32>
    %47 = vector.shape_cast %46 : vector<8xf32> to vector<8x1xf32>
    %48 = tpu.reciprocal %47 {approx = true} : vector<8x1xf32> -> vector<8x1xf32>
    %49 = vector.broadcast %48 : vector<8x1xf32> to vector<8x8xf32>
    %50 = arith.mulf %45, %49 : vector<8x8xf32>
    %c0_22 = arith.constant 0 : index
    %c16 = arith.constant 16 : index
    %51 = vector.load %arg4[%c0_22, %c16] : memref<8x64xbf16, #tpu.memory_space<vmem>>, vector<8x16xbf16>
    %52 = arith.truncf %50 : vector<8x8xf32> to vector<8x8xbf16>
    %cst_23 = arith.constant dense<0.000000e+00> : vector<8x16xf32>
    %53 = tpu.matmul %52, %51, %cst_23 {dimension_numbers = #tpu.dot_dimension_numbers<[1], [0], [0], [1], [0, 0, 1, 1], [], []>} : vector<8x8xbf16>, vector<8x16xbf16>, vector<8x16xf32> -> vector<8x16xf32>
    %c0_24 = arith.constant 0 : index
    %c2 = arith.constant 2 : index
    %54 = vector.load %arg2[%c0_24, %c2] : memref<8x4xf32, #tpu.memory_space<vmem>>, vector<8x1xf32>
    %c2_25 = arith.constant 2 : index
    %c0_26 = arith.constant 0 : index
    %55 = vector.load %arg3[%c2_25, %c0_26] : memref<4x8xf32, #tpu.memory_space<vmem>>, vector<1x8xf32>
    %56 = vector.broadcast %54 : vector<8x1xf32> to vector<8x8xf32>
    %57 = vector.broadcast %55 : vector<1x8xf32> to vector<8x8xf32>
    %58 = arith.addf %56, %57 : vector<8x8xf32>
    %c2_27 = arith.constant 2 : index
    %c0_28 = arith.constant 0 : index
    %c0_29 = arith.constant 0 : index
    %59 = vector.load %arg1[%c2_27, %c0_28, %c0_29] : memref<4x8x8xbf16, #tpu.memory_space<vmem>>, vector<1x8x8xbf16>
    %60 = vector.shape_cast %59 : vector<1x8x8xbf16> to vector<8x8xbf16>
    %61 = arith.extf %60 : vector<8x8xbf16> to vector<8x8xf32>
    %62 = arith.addf %58, %61 : vector<8x8xf32>
    %cst_30 = arith.constant 0.000000e+00 : f32
    %63 = vector.broadcast %cst_30 : f32 to vector<8x8xf32>
    %64 = arith.cmpf ogt, %62, %63 : vector<8x8xf32>
    %cst_31 = arith.constant 2.000000e-01 : f32
    %65 = vector.broadcast %cst_31 : f32 to vector<8x8xf32>
    %66 = arith.mulf %65, %62 : vector<8x8xf32>
    %67 = arith.select %64, %62, %66 : vector<8x8xi1>, vector<8x8xf32>
    %cst_32 = arith.constant dense<0xFF800000> : vector<8xf32>
    %68 = vector.multi_reduction <maximumf>, %67, %cst_32 [1] : vector<8x8xf32> to vector<8xf32>
    %69 = vector.shape_cast %68 : vector<8xf32> to vector<8x1xf32>
    %70 = vector.broadcast %69 : vector<8x1xf32> to vector<8x8xf32>
    %71 = arith.subf %67, %70 : vector<8x8xf32>
    %72 = math.exp %71 : vector<8x8xf32>
    %cst_33 = arith.constant dense<0.000000e+00> : vector<8xf32>
    %73 = vector.multi_reduction <add>, %72, %cst_33 [1] : vector<8x8xf32> to vector<8xf32>
    %74 = vector.shape_cast %73 : vector<8xf32> to vector<8x1xf32>
    %75 = tpu.reciprocal %74 {approx = true} : vector<8x1xf32> -> vector<8x1xf32>
    %76 = vector.broadcast %75 : vector<8x1xf32> to vector<8x8xf32>
    %77 = arith.mulf %72, %76 : vector<8x8xf32>
    %c0_34 = arith.constant 0 : index
    %c32 = arith.constant 32 : index
    %78 = vector.load %arg4[%c0_34, %c32] : memref<8x64xbf16, #tpu.memory_space<vmem>>, vector<8x16xbf16>
    %79 = arith.truncf %77 : vector<8x8xf32> to vector<8x8xbf16>
    %cst_35 = arith.constant dense<0.000000e+00> : vector<8x16xf32>
    %80 = tpu.matmul %79, %78, %cst_35 {dimension_numbers = #tpu.dot_dimension_numbers<[1], [0], [0], [1], [0, 0, 1, 1], [], []>} : vector<8x8xbf16>, vector<8x16xbf16>, vector<8x16xf32> -> vector<8x16xf32>
    %c0_36 = arith.constant 0 : index
    %c3 = arith.constant 3 : index
    %81 = vector.load %arg2[%c0_36, %c3] : memref<8x4xf32, #tpu.memory_space<vmem>>, vector<8x1xf32>
    %c3_37 = arith.constant 3 : index
    %c0_38 = arith.constant 0 : index
    %82 = vector.load %arg3[%c3_37, %c0_38] : memref<4x8xf32, #tpu.memory_space<vmem>>, vector<1x8xf32>
    %83 = vector.broadcast %81 : vector<8x1xf32> to vector<8x8xf32>
    %84 = vector.broadcast %82 : vector<1x8xf32> to vector<8x8xf32>
    %85 = arith.addf %83, %84 : vector<8x8xf32>
    %c3_39 = arith.constant 3 : index
    %c0_40 = arith.constant 0 : index
    %c0_41 = arith.constant 0 : index
    %86 = vector.load %arg1[%c3_39, %c0_40, %c0_41] : memref<4x8x8xbf16, #tpu.memory_space<vmem>>, vector<1x8x8xbf16>
    %87 = vector.shape_cast %86 : vector<1x8x8xbf16> to vector<8x8xbf16>
    %88 = arith.extf %87 : vector<8x8xbf16> to vector<8x8xf32>
    %89 = arith.addf %85, %88 : vector<8x8xf32>
    %cst_42 = arith.constant 0.000000e+00 : f32
    %90 = vector.broadcast %cst_42 : f32 to vector<8x8xf32>
    %91 = arith.cmpf ogt, %89, %90 : vector<8x8xf32>
    %cst_43 = arith.constant 2.000000e-01 : f32
    %92 = vector.broadcast %cst_43 : f32 to vector<8x8xf32>
    %93 = arith.mulf %92, %89 : vector<8x8xf32>
    %94 = arith.select %91, %89, %93 : vector<8x8xi1>, vector<8x8xf32>
    %cst_44 = arith.constant dense<0xFF800000> : vector<8xf32>
    %95 = vector.multi_reduction <maximumf>, %94, %cst_44 [1] : vector<8x8xf32> to vector<8xf32>
    %96 = vector.shape_cast %95 : vector<8xf32> to vector<8x1xf32>
    %97 = vector.broadcast %96 : vector<8x1xf32> to vector<8x8xf32>
    %98 = arith.subf %94, %97 : vector<8x8xf32>
    %99 = math.exp %98 : vector<8x8xf32>
    %cst_45 = arith.constant dense<0.000000e+00> : vector<8xf32>
    %100 = vector.multi_reduction <add>, %99, %cst_45 [1] : vector<8x8xf32> to vector<8xf32>
    %101 = vector.shape_cast %100 : vector<8xf32> to vector<8x1xf32>
    %102 = tpu.reciprocal %101 {approx = true} : vector<8x1xf32> -> vector<8x1xf32>
    %103 = vector.broadcast %102 : vector<8x1xf32> to vector<8x8xf32>
    %104 = arith.mulf %99, %103 : vector<8x8xf32>
    %c0_46 = arith.constant 0 : index
    %c48 = arith.constant 48 : index
    %105 = vector.load %arg4[%c0_46, %c48] : memref<8x64xbf16, #tpu.memory_space<vmem>>, vector<8x16xbf16>
    %106 = arith.truncf %104 : vector<8x8xf32> to vector<8x8xbf16>
    %cst_47 = arith.constant dense<0.000000e+00> : vector<8x16xf32>
    %107 = tpu.matmul %106, %105, %cst_47 {dimension_numbers = #tpu.dot_dimension_numbers<[1], [0], [0], [1], [0, 0, 1, 1], [], []>} : vector<8x8xbf16>, vector<8x16xbf16>, vector<8x16xf32> -> vector<8x16xf32>
    %108 = tpu.concatenate %26, %53, %80, %107 in 1 : vector<8x16xf32>, vector<8x16xf32>, vector<8x16xf32>, vector<8x16xf32> -> vector<8x64xf32>
    %c0_48 = arith.constant 0 : index
    %c0_49 = arith.constant 0 : index
    %109 = vector.load %arg5[%c0_48, %c0_49] : memref<1x64xf32, #tpu.memory_space<vmem>>, vector<1x64xf32>
    %110 = vector.broadcast %109 : vector<1x64xf32> to vector<8x64xf32>
    %111 = arith.addf %108, %110 : vector<8x64xf32>
    %cst_50 = arith.constant 0.000000e+00 : f32
    %112 = vector.broadcast %cst_50 : f32 to vector<8x64xf32>
    %113 = arith.cmpf ogt, %111, %112 : vector<8x64xf32>
    %cst_51 = arith.constant 0.000000e+00 : f32
    %114 = vector.broadcast %cst_51 : f32 to vector<8x64xf32>
    %115 = arith.minimumf %111, %114 : vector<8x64xf32>
    %116 = math.exp %115 : vector<8x64xf32>
    %cst_52 = arith.constant 1.000000e+00 : f32
    %117 = vector.broadcast %cst_52 : f32 to vector<8x64xf32>
    %118 = arith.subf %116, %117 : vector<8x64xf32>
    %119 = arith.select %113, %111, %118 : vector<8x64xi1>, vector<8x64xf32>
    %120 = arith.truncf %119 : vector<8x64xf32> to vector<8x64xbf16>
    %c0_53 = arith.constant 0 : index
    %c0_54 = arith.constant 0 : index
    %121 = vector.load %arg6[%c0_53, %c0_54] : memref<8x64xbf16, #tpu.memory_space<vmem>>, vector<8x64xbf16>
    tpu.vector_store %arg6[%c0_53, %c0_54], %120 {strides = array<i32>} : memref<8x64xbf16, #tpu.memory_space<vmem>>, vector<8x64xbf16>,
    return
  }
  func.func @transform_0(%arg0: i32) -> (i32, i32, i32) {
    %c0_i32 = arith.constant 0 : i32
    %c0_i32_0 = arith.constant 0 : i32
    %c0_i32_1 = arith.constant 0 : i32
    return %c0_i32, %arg0, %c0_i32_0 : i32, i32, i32
  }
  func.func @transform_1(%arg0: i32) -> (i32, i32) {
    %c0_i32 = arith.constant 0 : i32
    %c0_i32_0 = arith.constant 0 : i32
    return %arg0, %c0_i32 : i32, i32
  }
  func.func @transform_2(%arg0: i32) -> (i32, i32) {
    %c0_i32 = arith.constant 0 : i32
    %c0_i32_0 = arith.constant 0 : i32
    %c0_i32_1 = arith.constant 0 : i32
    return %c0_i32, %c0_i32_0 : i32, i32
  }
  func.func @transform_3(%arg0: i32) -> (i32, i32) {
    %c0_i32 = arith.constant 0 : i32
    %c0_i32_0 = arith.constant 0 : i32
    %c0_i32_1 = arith.constant 0 : i32
    return %c0_i32, %c0_i32_0 : i32, i32
  }
  func.func @transform_4(%arg0: i32) -> (i32, i32) {
    %c0_i32 = arith.constant 0 : i32
    %c0_i32_0 = arith.constant 0 : i32
    %c0_i32_1 = arith.constant 0 : i32
    return %c0_i32, %c0_i32_0 : i32, i32
  }
  func.func @transform_5(%arg0: i32) -> (i32, i32) {
    %c0_i32 = arith.constant 0 : i32
    %c0_i32_0 = arith.constant 0 : i32
    return %arg0, %c0_i32 : i32, i32
  }
}

module attributes {stable_mosaic.version = 11 : i64} {
  func.func @tail_kernel(%arg0: memref<8x64xbf16, #tpu.memory_space<vmem>>, %arg1: memref<8x8xbf16, #tpu.memory_space<vmem>>, %arg2: memref<64x16xbf16, #tpu.memory_space<vmem>>, %arg3: memref<16x2xbf16, #tpu.memory_space<vmem>>, %arg4: memref<1x16xf32, #tpu.memory_space<vmem>>, %arg5: memref<2x8xf32, #tpu.memory_space<vmem>>, %arg6: memref<2x2xf32, #tpu.memory_space<vmem>>, %arg7: memref<16x32xbf16, #tpu.memory_space<vmem>>, %arg8: memref<2x32xbf16, #tpu.memory_space<vmem>>, %arg9: memref<1x32xf32, #tpu.memory_space<vmem>>, %arg10: memref<32x64xbf16, #tpu.memory_space<vmem>>, %arg11: memref<1x64xf32, #tpu.memory_space<vmem>>, %arg12: memref<64x128xbf16, #tpu.memory_space<vmem>>, %arg13: memref<1x128xf32, #tpu.memory_space<vmem>>, %arg14: memref<2x128xf32, #tpu.memory_space<vmem>>) attributes {dimension_semantics = [], scalar_prefetch = 0 : i64, scratch_operands = 0 : i64, tpu.core_type = #tpu.core_type<tc>} {
    %c0 = arith.constant 0 : index
    %c0_0 = arith.constant 0 : index
    %0 = vector.load %arg0[%c0, %c0_0] : memref<8x64xbf16, #tpu.memory_space<vmem>>, vector<8x64xbf16>
    %c0_1 = arith.constant 0 : index
    %c0_2 = arith.constant 0 : index
    %1 = vector.load %arg2[%c0_1, %c0_2] : memref<64x16xbf16, #tpu.memory_space<vmem>>, vector<64x16xbf16>
    %cst = arith.constant dense<0.000000e+00> : vector<8x16xf32>
    %2 = tpu.matmul %0, %1, %cst {dimension_numbers = #tpu.dot_dimension_numbers<[1], [0], [0], [1], [0, 0, 1, 1], [], []>} : vector<8x64xbf16>, vector<64x16xbf16>, vector<8x16xf32> -> vector<8x16xf32>
    %c0_3 = arith.constant 0 : index
    %c0_4 = arith.constant 0 : index
    %3 = vector.load %arg3[%c0_3, %c0_4] : memref<16x2xbf16, #tpu.memory_space<vmem>>, vector<16x2xbf16>
    %4 = arith.truncf %2 : vector<8x16xf32> to vector<8x16xbf16>
    %cst_5 = arith.constant dense<0.000000e+00> : vector<8x2xf32>
    %5 = tpu.matmul %4, %3, %cst_5 {dimension_numbers = #tpu.dot_dimension_numbers<[1], [0], [0], [1], [0, 0, 1, 1], [], []>} : vector<8x16xbf16>, vector<16x2xbf16>, vector<8x2xf32> -> vector<8x2xf32>
    %6 = vector.extract_strided_slice %5 {offsets = [0, 1], sizes = [8, 1], strides = [1, 1]} : vector<8x2xf32> to vector<8x1xf32>
    %7 = vector.extract_strided_slice %5 {offsets = [0, 0], sizes = [8, 1], strides = [1, 1]} : vector<8x2xf32> to vector<8x1xf32>
    %8 = tpu.transpose %7, [1, 0] : vector<8x1xf32> -> vector<1x8xf32>
    %9 = vector.broadcast %6 : vector<8x1xf32> to vector<8x8xf32>
    %10 = vector.broadcast %8 : vector<1x8xf32> to vector<8x8xf32>
    %11 = arith.addf %9, %10 : vector<8x8xf32>
    %c0_6 = arith.constant 0 : index
    %c0_7 = arith.constant 0 : index
    %12 = vector.load %arg1[%c0_6, %c0_7] : memref<8x8xbf16, #tpu.memory_space<vmem>>, vector<8x8xbf16>
    %13 = arith.extf %12 : vector<8x8xbf16> to vector<8x8xf32>
    %14 = arith.addf %11, %13 : vector<8x8xf32>
    %cst_8 = arith.constant 0.000000e+00 : f32
    %15 = vector.broadcast %cst_8 : f32 to vector<8x8xf32>
    %16 = arith.cmpf ogt, %14, %15 : vector<8x8xf32>
    %cst_9 = arith.constant 2.000000e-01 : f32
    %17 = vector.broadcast %cst_9 : f32 to vector<8x8xf32>
    %18 = arith.mulf %17, %14 : vector<8x8xf32>
    %19 = arith.select %16, %14, %18 : vector<8x8xi1>, vector<8x8xf32>
    %cst_10 = arith.constant dense<0xFF800000> : vector<8xf32>
    %20 = vector.multi_reduction <maximumf>, %19, %cst_10 [1] : vector<8x8xf32> to vector<8xf32>
    %21 = vector.shape_cast %20 : vector<8xf32> to vector<8x1xf32>
    %22 = vector.broadcast %21 : vector<8x1xf32> to vector<8x8xf32>
    %23 = arith.subf %19, %22 : vector<8x8xf32>
    %24 = math.exp %23 : vector<8x8xf32>
    %cst_11 = arith.constant dense<0.000000e+00> : vector<8xf32>
    %25 = vector.multi_reduction <add>, %24, %cst_11 [1] : vector<8x8xf32> to vector<8xf32>
    %26 = vector.shape_cast %25 : vector<8xf32> to vector<8x1xf32>
    %27 = tpu.reciprocal %26 {approx = true} : vector<8x1xf32> -> vector<8x1xf32>
    %28 = vector.broadcast %27 : vector<8x1xf32> to vector<8x8xf32>
    %29 = arith.mulf %24, %28 : vector<8x8xf32>
    %30 = arith.truncf %29 : vector<8x8xf32> to vector<8x8xbf16>
    %31 = arith.truncf %2 : vector<8x16xf32> to vector<8x16xbf16>
    %cst_12 = arith.constant dense<0.000000e+00> : vector<8x16xf32>
    %32 = tpu.matmul %30, %31, %cst_12 {dimension_numbers = #tpu.dot_dimension_numbers<[1], [0], [0], [1], [0, 0, 1, 1], [], []>} : vector<8x8xbf16>, vector<8x16xbf16>, vector<8x16xf32> -> vector<8x16xf32>
    %c0_13 = arith.constant 0 : index
    %c0_14 = arith.constant 0 : index
    %33 = vector.load %arg4[%c0_13, %c0_14] : memref<1x16xf32, #tpu.memory_space<vmem>>, vector<1x16xf32>
    %34 = vector.broadcast %33 : vector<1x16xf32> to vector<8x16xf32>
    %35 = arith.addf %32, %34 : vector<8x16xf32>
    %c0_15 = arith.constant 0 : index
    %c0_16 = arith.constant 0 : index
    %36 = vector.load %arg5[%c0_15, %c0_16] : memref<2x8xf32, #tpu.memory_space<vmem>>, vector<2x8xf32>
    %cst_17 = arith.constant dense<0.000000e+00> : vector<2x16xf32>
    %37 = tpu.matmul %36, %35, %cst_17 {dimension_numbers = #tpu.dot_dimension_numbers<[1], [0], [0], [1], [0, 0, 1, 1], [], []>} : vector<2x8xf32>, vector<8x16xf32>, vector<2x16xf32> -> vector<2x16xf32>
    %c0_18 = arith.constant 0 : index
    %c0_19 = arith.constant 0 : index
    %38 = vector.load %arg7[%c0_18, %c0_19] : memref<16x32xbf16, #tpu.memory_space<vmem>>, vector<16x32xbf16>
    %39 = arith.truncf %37 : vector<2x16xf32> to vector<2x16xbf16>
    %cst_20 = arith.constant dense<0.000000e+00> : vector<2x32xf32>
    %40 = tpu.matmul %39, %38, %cst_20 {dimension_numbers = #tpu.dot_dimension_numbers<[1], [0], [0], [1], [0, 0, 1, 1], [], []>} : vector<2x16xbf16>, vector<16x32xbf16>, vector<2x32xf32> -> vector<2x32xf32>
    %c0_21 = arith.constant 0 : index
    %c0_22 = arith.constant 0 : index
    %41 = vector.load %arg6[%c0_21, %c0_22] : memref<2x2xf32, #tpu.memory_space<vmem>>, vector<2x2xf32>
    %c0_23 = arith.constant 0 : index
    %c0_24 = arith.constant 0 : index
    %42 = vector.load %arg8[%c0_23, %c0_24] : memref<2x32xbf16, #tpu.memory_space<vmem>>, vector<2x32xbf16>
    %43 = arith.truncf %41 : vector<2x2xf32> to vector<2x2xbf16>
    %cst_25 = arith.constant dense<0.000000e+00> : vector<2x32xf32>
    %44 = tpu.matmul %43, %42, %cst_25 {dimension_numbers = #tpu.dot_dimension_numbers<[1], [0], [0], [1], [0, 0, 1, 1], [], []>} : vector<2x2xbf16>, vector<2x32xbf16>, vector<2x32xf32> -> vector<2x32xf32>
    %45 = arith.addf %40, %44 : vector<2x32xf32>
    %c0_26 = arith.constant 0 : index
    %c0_27 = arith.constant 0 : index
    %46 = vector.load %arg9[%c0_26, %c0_27] : memref<1x32xf32, #tpu.memory_space<vmem>>, vector<1x32xf32>
    %47 = vector.broadcast %46 : vector<1x32xf32> to vector<2x32xf32>
    %48 = arith.addf %45, %47 : vector<2x32xf32>
    %cst_28 = arith.constant 0.000000e+00 : f32
    %49 = vector.broadcast %cst_28 : f32 to vector<2x32xf32>
    %50 = arith.maximumf %48, %49 : vector<2x32xf32>
    %c0_29 = arith.constant 0 : index
    %c0_30 = arith.constant 0 : index
    %51 = vector.load %arg10[%c0_29, %c0_30] : memref<32x64xbf16, #tpu.memory_space<vmem>>, vector<32x64xbf16>
    %52 = arith.truncf %50 : vector<2x32xf32> to vector<2x32xbf16>
    %cst_31 = arith.constant dense<0.000000e+00> : vector<2x64xf32>
    %53 = tpu.matmul %52, %51, %cst_31 {dimension_numbers = #tpu.dot_dimension_numbers<[1], [0], [0], [1], [0, 0, 1, 1], [], []>} : vector<2x32xbf16>, vector<32x64xbf16>, vector<2x64xf32> -> vector<2x64xf32>
    %c0_32 = arith.constant 0 : index
    %c0_33 = arith.constant 0 : index
    %54 = vector.load %arg11[%c0_32, %c0_33] : memref<1x64xf32, #tpu.memory_space<vmem>>, vector<1x64xf32>
    %55 = vector.broadcast %54 : vector<1x64xf32> to vector<2x64xf32>
    %56 = arith.addf %53, %55 : vector<2x64xf32>
    %cst_34 = arith.constant 0.000000e+00 : f32
    %57 = vector.broadcast %cst_34 : f32 to vector<2x64xf32>
    %58 = arith.maximumf %56, %57 : vector<2x64xf32>
    %c0_35 = arith.constant 0 : index
    %c0_36 = arith.constant 0 : index
    %59 = vector.load %arg12[%c0_35, %c0_36] : memref<64x128xbf16, #tpu.memory_space<vmem>>, vector<64x128xbf16>
    %60 = arith.truncf %58 : vector<2x64xf32> to vector<2x64xbf16>
    %cst_37 = arith.constant dense<0.000000e+00> : vector<2x128xf32>
    %61 = tpu.matmul %60, %59, %cst_37 {dimension_numbers = #tpu.dot_dimension_numbers<[1], [0], [0], [1], [0, 0, 1, 1], [], []>} : vector<2x64xbf16>, vector<64x128xbf16>, vector<2x128xf32> -> vector<2x128xf32>
    %c0_38 = arith.constant 0 : index
    %c0_39 = arith.constant 0 : index
    %62 = vector.load %arg13[%c0_38, %c0_39] : memref<1x128xf32, #tpu.memory_space<vmem>>, vector<1x128xf32>
    %63 = vector.broadcast %62 : vector<1x128xf32> to vector<2x128xf32>
    %64 = arith.addf %61, %63 : vector<2x128xf32>
    %c0_40 = arith.constant 0 : index
    %c0_41 = arith.constant 0 : index
    %65 = vector.load %arg14[%c0_40, %c0_41] : memref<2x128xf32, #tpu.memory_space<vmem>>, vector<2x128xf32>
    tpu.vector_store %arg14[%c0_40, %c0_41], %64 {strides = array<i32>} : memref<2x128xf32, #tpu.memory_space<vmem>>, vector<2x128xf32>,
    return
  }
}

</mosaic_0001>

<bundles_post_ra>
// kernel: polymer_gnn_forward.3
= control target key start
LH: loop header
LB: loop body
LE: loop exit
PB: predicated region body
PF: predicated region fallthrough
CT: control target
= control target key end

     0   :  { %v536_v0 = vmov 0.0   ;;  %vm537_vm0 = vmmov 0   ;;  %vm183_vm1 = vcmask 523264   ;;  %vm244_vm2 = vcmask 261120   ;;  %s538_s26 = smov 124   ;;  %s689_s1 = inlined_call_operand.vmem [shape: bf16[128,64], index: 1, kind: input, shape index: {}]   ;;  %s690_s3 = inlined_call_operand.vmem [shape: bf16[64,32], index: 3, kind: input, shape index: {}]   ;;  %s691_s0 = inlined_call_operand.vmem [shape: bf16[8,128], index: 0, kind: input, shape index: {}]   ;;  %s692_s5 = inlined_call_operand.vmem [shape: bf16[32,64], index: 5, kind: input, shape index: {}]   ;;  %s693_s2 = inlined_call_operand.vmem [shape: f32[1,64], index: 2, kind: input, shape index: {}]   ;;  %s694_s6 = inlined_call_operand.vmem [shape: bf16[64,8], index: 6, kind: input, shape index: {}]   ;;  %s695_s4 = inlined_call_operand.vmem [shape: f32[1,32], index: 4, kind: input, shape index: {}]   ;;  %s696_s7 = inlined_call_operand.vmem [shape: bf16[8,64], index: 7, kind: output, shape index: {0}]   ;;  %s697_s8 = inlined_call_operand.vmem [shape: f32[8,4], index: 8, kind: output, shape index: {1}]   ;;  %s698_s9 = inlined_call_operand.vmem [shape: f32[4,8], index: 9, kind: output, shape index: {2}]  }
   0x1   :  { %463 = vmatprep.subr.bf16.mxu0 %v536_v0  ;;  %v518_v1 = vld [vmem:[%s689_s1] sm:$0xff]   ;;  %479 = vmatprep.mubr.msk.bf16.mxu0 %vm537_vm0, %v536_v0  ;;  %v519_v2 = vld [vmem:[%s689_s1 + $0x8] sm:$0xff]   ;;  %v520_v3 = vld [vmem:[%s689_s1 + $0x10] sm:$0xff]   ;;  %vm289_vm3 = vcmask 519168   ;;  %vm370_vm4 = vcmask 31744   ;;  %vm404_vm5 = vcmask 60416  }
   0x2   :  { %483 = vmatprep.subr.bf16.mxu1 %v536_v0  ;;  %491 = vmatprep.mubr.msk.bf16.mxu1 %vm537_vm0, %v536_v0  ;;  %v526_v4 = vld [vmem:[%s690_s3] sm:$0xff]   ;;  %v521_v5 = vld [vmem:[%s689_s1 + $0x18] sm:$0xff]   ;;  %v527_v6 = vld [vmem:[%s690_s3 + $0x8] sm:$0xff]  }
   0x3   :  { %464 = vmatpush3.bf16.msra.mxu0 %v518_v1  ;;  %484 = vmatpush3.bf16.msra.mxu1 %v526_v4  ;;  %v522_v7 = vld [vmem:[%s689_s1 + $0x20] sm:$0xff]   ;;  %v523_v8 = vld [vmem:[%s689_s1 + $0x28] sm:$0xff]   ;;  %v524_v9 = vld [vmem:[%s689_s1 + $0x30] sm:$0xff]  }
   0x4   :  { %465 = vmatprep.subr.bf16.mxu0 %v536_v0  ;;  %485 = vmatprep.subr.bf16.mxu1 %v536_v0  ;;  %v525_v10 = vld [vmem:[%s689_s1 + $0x38] sm:$0xff]   ;;  %v30_v11 = vld [vmem:[%s691_s0] sm:$0xf]  ;;  %v528_v12 = vld [vmem:[%s690_s3 + $0x10] sm:$0xff]  }
   0x5   :  { %v529_v13 = vld [vmem:[%s690_s3 + $0x18] sm:$0xff]   ;;  %v418_v14 = vld [vmem:[%s693_s2] ss:$0 sm:$0xff]  ;;  %v531_v23 = vld [vmem:[%s692_s5 + $0x8] sm:$0xff]  }
   0x6   :  { %v530_v21 = vld [vmem:[%s692_s5] sm:$0xff]   ;;  %v533_v32 = vld [vmem:[%s694_s6 + $0x8] sm:$0xff]   ;;  %v534_v33 = vld [vmem:[%s694_s6 + $0x10] sm:$0xff]  }
   0x7   :  { %466 = vmatpush3.bf16.msra.mxu0 %v519_v2  ;;  %486 = vmatpush3.bf16.msra.mxu1 %v527_v6  ;;  %v427_v24 = vld [vmem:[%s695_s4] ss:$0 sm:$0xff]  ;;  %v535_v34 = vld [vmem:[%s694_s6 + $0x18] sm:$0xff]  }
   0x8   :  { %467 = vmatprep.subr.bf16.mxu0 %v536_v0  ;;  %487 = vmatprep.subr.bf16.mxu1 %v536_v0  ;;  %v532_v29 = vld [vmem:[%s694_s6] sm:$0xff]  }
   0xb   :  { %468 = vmatpush3.bf16.msra.mxu0 %v520_v3  ;;  %488 = vmatpush3.bf16.msra.mxu1 %v528_v12 }
   0xc   :  { %469 = vmatprep.subr.bf16.mxu0 %v536_v0  ;;  %489 = vmatprep.subr.bf16.mxu1 %v536_v0 }
   0xf   :  { %470 = vmatpush3.bf16.msra.mxu0 %v521_v5  ;;  %490 = vmatpush3.bf16.msra.mxu1 %v529_v13 }
  0x10   :  { %471 = vmatprep.subr.bf16.mxu0 %v536_v0  ;;  %495 = vmatprep.subr.bf16.mxu1 %v536_v0 }
  0x13   :  { %472 = vmatpush3.bf16.msra.mxu0 %v522_v7 }
  0x14   :  { %473 = vmatprep.subr.bf16.mxu0 %v536_v0 }
  0x17   :  { %474 = vmatpush3.bf16.msra.mxu0 %v523_v8 }
  0x18   :  { %475 = vmatprep.subr.bf16.mxu0 %v536_v0 }
  0x1b   :  { %476 = vmatpush3.bf16.msra.mxu0 %v524_v9 }
  0x1c   :  { %477 = vmatprep.subr.bf16.mxu0 %v536_v0 }
  0x1f   :  { %478 = vmatpush3.bf16.msra.mxu0 %v525_v10 }
  0x22   :  { %480 = vmatmul.mubr.bf16.vlgmr.msra.gmra.mrb[0].mxu0 %v30_v11 }
  0xf5   :  { %v136_v15 = vpop.f32.mrb[0].mxu0 }
  0xf6   :  { %v137_v16 = vadd.f32 %v418_v14, %v136_v15  ;;  %v481_v17 = vpop.f32.mrb[1].mxu0 }
  0xf7   :  { %v139_v18 = vpop.f32.mrb[2].mxu0 }
  0xf8   :  { %v142_v19 = vmax.f32 %v137_v16, 0.0  ;;  %v482_v20 = vpop.f32.mrb[3].mxu0 }
  0xfa   :  { %v151_v22 = vpack.c.bf16 %v142_v19, %v142_v19 }
  0xfc   :  { %492 = vmatmul.mubr.msk.bf16.vlgmr.msra.gmra.mrb[0].mxu1 %vm183_vm1, %v151_v22 }
  0xfd   :  { %496 = vmatpush3.bf16.msra.mxu1 %v530_v21  ;;  %499 = vmatprep.mubr.msk.bf16.mxu1 %vm537_vm0, %v536_v0 }
  0xfe   :  { %497 = vmatprep.subr.bf16.mxu1 %v536_v0 }
 0x101   :  { %498 = vmatpush3.bf16.msra.mxu1 %v531_v23 }
 0x102   :  { %503 = vmatprep.subr.bf16.mxu1 %v536_v0 }
 0x1cf   :  { %v221_v25 = vpop.f32.mrb[0].mxu1 }
 0x1d0   :  { %v222_v26 = vadd.f32 %v427_v24, %v221_v25  ;;  %v493_v27 = vpop.f32.mrb[1].mxu1 }
 0x1d1   :  { %v224_v28 = vpop.f32.mrb[2].mxu1 }
 0x1d2   :  { %v231_v30 = vpack.c.bf16 %v222_v26, %v222_v26  ;;  %v494_v31 = vpop.f32.mrb[3].mxu1 }
 0x1d4   :  { %500 = vmatmul.mubr.msk.bf16.vlgmr.msra.gmra.mrb[4].mxu1 %vm244_vm2, %v231_v30 }
 0x1d5   :  { %504 = vmatpush3.bf16.msra.mxu1 %v532_v29  ;;  %511 = vmatprep.mubr.msk.bf16.mxu1 %vm537_vm0, %v536_v0 }
 0x1d6   :  { %505 = vmatprep.subr.bf16.mxu1 %v536_v0 }
 0x1d9   :  { %506 = vmatpush3.bf16.msra.mxu1 %v533_v32 }
 0x1da   :  { %507 = vmatprep.subr.bf16.mxu1 %v536_v0 }
 0x1dd   :  { %508 = vmatpush3.bf16.msra.mxu1 %v534_v33 }
 0x1de   :  { %509 = vmatprep.subr.bf16.mxu1 %v536_v0 }
 0x1e1   :  { %510 = vmatpush3.bf16.msra.mxu1 %v535_v34 }
 0x2a7   :  { %v282_v35 = vpop.f32.mrb[4].mxu1 }
 0x2a8   :  { %v288_v36 = vpack.c.bf16 %v282_v35, %v282_v35  ;;  %v501_v37 = vpop.f32.mrb[5].mxu1 }
 0x2a9   :  { %v285_v38 = vpop.f32.mrb[6].mxu1 }
 0x2aa   :  { %290 = vst.msk [vmem:[%s696_s7] sm:$0xf] %vm289_vm3, %v288_v36  ;;  %v502_v39 = vpop.f32.mrb[7].mxu1  ;;  %512 = vmatmul.mubr.msk.bf16.vlgmr.msra.gmra.mrb[8].mxu1 %vm183_vm1, %v288_v36 }
 0x37d   :  { %v360_v40 = vpop.f32.mrb[8].mxu1 }
 0x37e   :  { %367 = vrot.lane.b32.xlu0 %v360_v40, %s538_s26  ;;  %v513_v41 = vpop.f32.mrb[9].mxu1 }
 0x37f   :  { %v363_v42 = vpop.f32.mrb[10].mxu1 }
 0x380   :  { %v514_v43 = vpop.f32.mrb[11].mxu1 }
 0x39c   :  { %372 = vxpose.xlu0.b32.start.end [1/1] (short) (narrow) %v360_v40, 8 }
 0x3f0   :  { %v368_v44 = vpop.permute.xlu0 %367 }
 0x3f1   :  { %371 = vst.msk [vmem:[%s697_s8] sm:$0xff] %vm370_vm4, %v368_v44 }
 0x41c   :  { %v388_v45 = vpop.trf.xlu0 }
 0x41d   :  { %405 = vst.msk [vmem:[%s698_s9] sm:$0xf] %vm404_vm5, %v388_v45 }

// kernel: polymer_gnn_forward.4
= control target key start
LH: loop header
LB: loop body
LE: loop exit
PB: predicated region body
PF: predicated region fallthrough
CT: control target
= control target key end

     0   :  { %v455_v0 = vmov 2   ;;  %v456_v1 = vmov 0   ;;  %v457_v3 = vmov 3   ;;  %v458_v4 = vmov 1   ;;  %s459_s6 = smov 96   ;;  %s462_s7 = smov 112   ;;  %s547_s1 = inlined_call_operand.vmem [shape: f32[8,4], index: 1, kind: input, shape index: {}]   ;;  %s548_s0 = inlined_call_operand.vmem [shape: bf16[4,8,8], index: 0, kind: input, shape index: {}]   ;;  %s549_s2 = inlined_call_operand.vmem [shape: f32[4,8], index: 2, kind: input, shape index: {}]   ;;  %s550_s3 = inlined_call_operand.vmem [shape: bf16[8,64], index: 3, kind: input, shape index: {}]   ;;  %s551_s4 = inlined_call_operand.vmem [shape: f32[1,64], index: 4, kind: input, shape index: {}]   ;;  %s552_s5 = inlined_call_operand.vmem [shape: bf16[8,64], index: 5, kind: output, shape index: {}]  }
   0x1   :  { %433 = vset.pattern.permute.xlu1 %v455_v0  ;;  %431 = vset.pattern.permute.xlu0 %v456_v1  ;;  %v21_v2 = vld [vmem:[%s547_s1] sm:$0xff]  ;;  %v380_v9 = vld [vmem:[%s548_s0 + $0x8] sm:$0xff]   ;;  %vm39_vm1 = vcmask 64512   ;;  %vm56_vm5 = vcmask 1043456   ;;  %v460_v56 = vmov 0.0   ;;  %vm461_vm6 = vmmov 0  }
   0x2   :  { %182 = vperm.xlu1 %433, %v21_v2   ;;  %25 = vperm.xlu0 %431, %v21_v2   ;;  %v33_v5 = vld [vmem:[%s548_s0] sm:$0xff]   ;;  %v192_v12 = vunpack.c.l.bf16 %v380_v9  ;;  %v269_v19 = vunpack.c.h.bf16 %v380_v9  ;;  %s464_s8 = smov 16   ;;  %s465_s9 = smov 32   ;;  %vm346_vm7 = vcmask 130048   ;;  %vm348_vm8 = vcmask 261120  }
   0x3   :  { %v373_v6 = vld [vmem:[%s549_s2] ss:$0 sm:$0xff]  ;;  %v379_v7 = vld [vmem:[%s549_s2 + $0x2] ss:$0 sm:$0xff]  ;;  %v34_v8 = vunpack.c.l.bf16 %v33_v5  ;;  %v382_v16 = vld [vmem:[%s549_s2 + $0x3] ss:$0 sm:$0xff]  ;;  %v112_v20 = vunpack.c.h.bf16 %v33_v5  ;;  %395 = vmatprep.subr.bf16.mxu0 %v460_v56  ;;  %401 = vmatprep.subr.bf16.mxu1 %v460_v56 }
   0x4   :  { %v375_v17 = vld [vmem:[%s549_s2 + $0x1] ss:$0 sm:$0xff]  ;;  %397 = vmatprep.mubr.msk.bf16.mxu0 %vm461_vm6, %v460_v56  ;;  %403 = vmatprep.mubr.msk.bf16.mxu1 %vm461_vm6, %v460_v56  ;;  %s466_s10 = smov 48   ;;  %vm350_vm9 = vcmask 392192   ;;  %vm367_vm11 = vcmask 519168  }
   0x5   :  { %v51_v54 = vld [vmem:[%s550_s3] sm:$0xf]  ;;  %s463_s3 = smov 80  }
   0x6   :  { %434 = vset.pattern.permute.xlu1 %v457_v3  ;;  %432 = vset.pattern.permute.xlu0 %v458_v4  ;;  %v377_v55 = vcombine.low %v51_v54, %v51_v54  ;;  %v58_v57 = vsel %vm56_vm5, %v51_v54, 0 }
   0x7   :  { %259 = vperm.xlu1 %434, %v21_v2   ;;  %102 = vperm.xlu0 %432, %v21_v2  }
   0x8   :  { %396 = vmatpush3.bf16.msra.mxu0 %v58_v57 }
   0x9   :  { %407 = vmatprep.subr.bf16.mxu0 %v460_v56 }
   0xb   :  { %435 = vset.pattern.permute.xlu0 %v457_v3 }
  0x81   :  { %v26_v10 = vpop.permute.xlu0 %25  ;;  %v183_v11 = vpop.permute.xlu1 %182 }
  0x82   :  { %v32_v13 = vadd.f32 %v373_v6, %v26_v10  ;;  %v189_v14 = vadd.f32 %v379_v7, %v183_v11 }
  0x84   :  { %v35_v15 = vadd.f32 %v34_v8, %v32_v13  ;;  %v193_v18 = vadd.f32 %v192_v12, %v189_v14 }
  0x86   :  { %v260_v21 = vpop.permute.xlu1 %259  ;;  %v103_v22 = vpop.permute.xlu0 %102  ;;  %vm36_vm0 = vcmp.gt.f32.partialorder %v35_v15, 0.0  ;;  %v37_v23 = vmul.f32 0.2, %v35_v15  ;;  %v195_v30 = vmul.f32 0.2, %v193_v18  ;;  %vm194_vm2 = vcmp.gt.f32.partialorder %v193_v18, 0.0 }
  0x87   :  { %v266_v24 = vadd.f32 %v382_v16, %v260_v21  ;;  %v109_v25 = vadd.f32 %v375_v17, %v103_v22 }
  0x88   :  { %v38_v26 = vsel %vm36_vm0, %v35_v15, %v37_v23  ;;  %v196_v35 = vsel %vm194_vm2, %v193_v18, %v195_v30 }
  0x89   :  { %v270_v27 = vadd.f32 %v269_v19, %v266_v24  ;;  %v113_v28 = vadd.f32 %v112_v20, %v109_v25  ;;  %v40_v29 = vsel %vm39_vm1, %v38_v26, -inf  ;;  %v197_v38 = vsel %vm39_vm1, %v196_v35, -inf }
  0x8a   :  { %41 = vmax.xlane.f32.xlu1 %v40_v29 }
  0x8b   :  { %vm114_vm3 = vcmp.gt.f32.partialorder %v113_v28, 0.0  ;;  %v115_v31 = vmul.f32 0.2, %v113_v28  ;;  %vm271_vm4 = vcmp.gt.f32.partialorder %v270_v27, 0.0  ;;  %v272_v32 = vmul.f32 0.2, %v270_v27 }
  0x8d   :  { %v116_v33 = vsel %vm114_vm3, %v113_v28, %v115_v31  ;;  %v273_v34 = vsel %vm271_vm4, %v270_v27, %v272_v32 }
  0x8e   :  { %v117_v36 = vsel %vm39_vm1, %v116_v33, -inf  ;;  %v274_v37 = vsel %vm39_vm1, %v273_v34, -inf }
  0x8f   :  { %118 = vmax.xlane.f32.xlu0 %v117_v36  ;;  %275 = vmax.xlane.f32.xlu1 %v274_v37 }
  0x93   :  { %198 = vmax.xlane.f32.xlu0 %v197_v38 }
 0x117   :  { %v42_v39 = vpop.xlane.xlu1 %41 }
 0x118   :  { %v43_v40 = vsub.f32 %v38_v26, %v42_v39 }
 0x11a   :  { %v44_v41 = vmul.f32 1.442695, %v43_v40  ;;  %v385_v40 = vld [vmem:[%s551_s4] ss:$0 sm:$0xff] }
 0x11c   :  { %437 = vpow2.f32 %v44_v41  ;;  %v119_v42 = vpop.xlane.xlu0 %118  ;;  %v276_v58 = vpop.xlane.xlu1 %275 }
 0x11d   :  { %v120_v43 = vsub.f32 %v116_v33, %v119_v42  ;;  %v277_v59 = vsub.f32 %v273_v34, %v276_v58 }
 0x11f   :  { %v121_v44 = vmul.f32 1.442695, %v120_v43  ;;  %v278_v60 = vmul.f32 1.442695, %v277_v59 }
 0x120   :  { %v199_v45 = vpop.xlane.xlu0 %198 }
 0x121   :  { %439 = vpow2.f32 %v121_v44  ;;  %v200_v46 = vsub.f32 %v196_v35, %v199_v45 }
 0x123   :  { %v201_v47 = vmul.f32 1.442695, %v200_v46 }
 0x125   :  { %441 = vpow2.f32 %v201_v47 }
 0x126   :  { %v438_v48 = vpop.eup %437  ;;  %443 = vpow2.f32 %v278_v60 }
 0x127   :  { %v46_v49 = vsel %vm39_vm1, %v438_v48, 0.0 }
 0x128   :  { %47 = vadd.xlane.f32.xlu0 %v46_v49 }
 0x12b   :  { %v440_v50 = vpop.eup %439 }
 0x12c   :  { %v123_v51 = vsel %vm39_vm1, %v440_v50, 0.0 }
 0x12d   :  { %124 = vadd.xlane.f32.xlu1 %v123_v51 }
 0x12f   :  { %v442_v52 = vpop.eup %441 }
 0x130   :  { %v203_v53 = vsel %vm39_vm1, %v442_v52, 0.0  ;;  %v444_v61 = vpop.eup %443 }
 0x131   :  { %204 = vadd.xlane.f32.xlu0 %v203_v53  ;;  %v280_v62 = vsel %vm39_vm1, %v444_v61, 0.0 }
 0x13e   :  { %209 = vrot.lane.b32.xlu1 %v377_v55, %s459_s6 }
 0x147   :  { %132 = vrot.lane.b32.xlu0 %v377_v55, %s462_s7 }
 0x162   :  { %281 = vadd.xlane.f32.xlu1 %v280_v62 }
 0x173   :  { %286 = vrot.lane.b32.xlu1 %v377_v55, %s463_s3 }
 0x1b5   :  { %v48_v63 = vpop.xlane.xlu0 %47 }
 0x1b6   :  { %445 = vrcp.f32 %v48_v63 }
 0x1ba   :  { %v125_v0 = vpop.xlane.xlu1 %124 }
 0x1bb   :  { %447 = vrcp.f32 %v125_v0 }
 0x1be   :  { %v205_v1 = vpop.xlane.xlu0 %204  ;;  %v210_v4 = vpop.permute.xlu1 %209 }
 0x1bf   :  { %449 = vrcp.f32 %v205_v1  ;;  %v215_v9 = vsel %vm56_vm5, %v210_v4, 0 }
 0x1c0   :  { %v446_v2 = vpop.eup %445 }
 0x1c1   :  { %v50_v3 = vmul.f32 %v446_v2, %v438_v48 }
 0x1c2   :  { %v133_v5 = vpop.permute.xlu0 %132 }
 0x1c3   :  { %v52_v6 = vpack.c.bf16 %v50_v3, %v50_v3  ;;  %v138_v7 = vsel %vm56_vm5, %v133_v5, 0 }
 0x1c4   :  { %402 = vmatpush3.bf16.msra.mxu1 %v138_v7 }
 0x1c5   :  { %v448_v8 = vpop.eup %447  ;;  %398 = vmatmul.mubr.msk.bf16.vlgmr.msra.gmra.mrb[0].mxu0 %vm39_vm1, %v52_v6  ;;  %413 = vmatprep.subr.bf16.mxu1 %v460_v56 }
 0x1c6   :  { %408 = vmatpush3.bf16.msra.mxu0 %v215_v9  ;;  %v127_v10 = vmul.f32 %v448_v8, %v440_v50  ;;  %409 = vmatprep.mubr.msk.bf16.mxu0 %vm461_vm6, %v460_v56 }
 0x1c8   :  { %v128_v11 = vpack.c.bf16 %v127_v10, %v127_v10 }
 0x1c9   :  { %v450_v12 = vpop.eup %449 }
 0x1ca   :  { %v207_v13 = vmul.f32 %v450_v12, %v442_v52  ;;  %404 = vmatmul.mubr.msk.bf16.vlgmr.msra.gmra.mrb[0].mxu1 %vm39_vm1, %v128_v11 }
 0x1cb   :  { %415 = vmatprep.mubr.msk.bf16.mxu1 %vm461_vm6, %v460_v56 }
 0x1cc   :  { %v208_v14 = vpack.c.bf16 %v207_v13, %v207_v13 }
 0x1ce   :  { %410 = vmatmul.mubr.msk.bf16.vlgmr.msra.gmra.mrb[4].mxu0 %vm39_vm1, %v208_v14 }
 0x1ef   :  { %v282_v15 = vpop.xlane.xlu1 %281 }
 0x1f0   :  { %451 = vrcp.f32 %v282_v15 }
 0x1f3   :  { %v287_v16 = vpop.permute.xlu1 %286 }
 0x1f4   :  { %v292_v17 = vsel %vm56_vm5, %v287_v16, 0 }
 0x1f5   :  { %414 = vmatpush3.bf16.msra.mxu1 %v292_v17 }
 0x1fa   :  { %v452_v18 = vpop.eup %451 }
 0x1fb   :  { %v284_v19 = vmul.f32 %v452_v18, %v444_v61 }
 0x1fd   :  { %v285_v20 = vpack.c.bf16 %v284_v19, %v284_v19 }
 0x1ff   :  { %416 = vmatmul.mubr.msk.bf16.vlgmr.msra.gmra.mrb[4].mxu1 %vm39_vm1, %v285_v20 }
 0x298   :  { %v94_v21 = vpop.f32.mrb[0].mxu0 }
 0x299   :  { %v399_v22 = vpop.f32.mrb[1].mxu0 }
 0x29a   :  { %v97_v23 = vpop.f32.mrb[2].mxu0 }
 0x29b   :  { %v400_v24 = vpop.f32.mrb[3].mxu0 }
 0x29d   :  { %v174_v25 = vpop.f32.mrb[0].mxu1 }
 0x29e   :  { %335 = vrot.lane.b32.xlu0 %v174_v25, %s464_s8  ;;  %v405_v26 = vpop.f32.mrb[1].mxu1 }
 0x29f   :  { %v177_v27 = vpop.f32.mrb[2].mxu1 }
 0x2a0   :  { %v406_v28 = vpop.f32.mrb[3].mxu1 }
 0x2a1   :  { %v251_v29 = vpop.f32.mrb[4].mxu0 }
 0x2a2   :  { %339 = vrot.lane.b32.xlu1 %v251_v29, %s465_s9  ;;  %v411_v30 = vpop.f32.mrb[5].mxu0 }
 0x2a3   :  { %v254_v31 = vpop.f32.mrb[6].mxu0 }
 0x2a4   :  { %v412_v32 = vpop.f32.mrb[7].mxu0 }
 0x2d2   :  { %v328_v33 = vpop.f32.mrb[4].mxu1 }
 0x2d3   :  { %343 = vrot.lane.b32.xlu0 %v328_v33, %s466_s10  ;;  %v417_v34 = vpop.f32.mrb[5].mxu1 }
 0x2d4   :  { %v331_v35 = vpop.f32.mrb[6].mxu1 }
 0x2d5   :  { %v418_v36 = vpop.f32.mrb[7].mxu1 }
 0x310   :  { %v336_v37 = vpop.permute.xlu0 %335 }
 0x311   :  { %v347_v39 = vsel %vm346_vm7, %v94_v21, %v336_v37 }
 0x314   :  { %v340_v38 = vpop.permute.xlu1 %339 }
 0x315   :  { %v349_v41 = vsel %vm348_vm8, %v347_v39, %v340_v38 }
 0x345   :  { %v344_v42 = vpop.permute.xlu0 %343 }
 0x346   :  { %v351_v43 = vsel %vm350_vm9, %v349_v41, %v344_v42 }
 0x347   :  { %v359_v44 = vadd.f32 %v385_v40, %v351_v43 }
 0x349   :  { %v361_v45 = vmin.f32 %v359_v44, 0.0  ;;  %vm360_vm10 = vcmp.gt.f32.partialorder %v359_v44, 0.0 }
 0x34b   :  { %v362_v46 = vmul.f32 1.442695, %v361_v45 }
 0x34d   :  { %453 = vpow2.f32 %v362_v46 }
 0x357   :  { %v454_v47 = vpop.eup %453 }
 0x358   :  { %v386_v48 = vadd.f32 -1.0, %v454_v47 }
 0x35a   :  { %v365_v49 = vsel %vm360_vm10, %v359_v44, %v386_v48 }
 0x35b   :  { %v366_v50 = vpack.c.bf16 %v365_v49, %v365_v49 }
 0x35d   :  { %368 = vst.msk [vmem:[%s552_s5] sm:$0xf] %vm367_vm11, %v366_v50 }

// kernel: polymer_gnn_forward.5
= control target key start
LH: loop header
LB: loop body
LE: loop exit
PB: predicated region body
PF: predicated region fallthrough
CT: control target
= control target key end

     0   :  { %v799_v1 = vmov 0.0   ;;  %vm800_vm0 = vmmov 0   ;;  %s992_s0 = inlined_call_operand.vmem [shape: bf16[8,64], index: 0, kind: input, shape index: {}]   ;;  %s993_s1 = inlined_call_operand.vmem [shape: bf16[8,8], index: 1, kind: input, shape index: {}]   ;;  %s994_s2 = inlined_call_operand.vmem [shape: bf16[64,16], index: 2, kind: input, shape index: {}]   ;;  %s995_s3 = inlined_call_operand.vmem [shape: bf16[16,2], index: 3, kind: input, shape index: {}]   ;;  %s996_s4 = inlined_call_operand.vmem [shape: f32[1,16], index: 4, kind: input, shape index: {}]   ;;  %s997_s5 = inlined_call_operand.vmem [shape: f32[2,8], index: 5, kind: input, shape index: {}]   ;;  %s998_s6 = inlined_call_operand.vmem [shape: f32[2,2], index: 6, kind: input, shape index: {}]   ;;  %s999_s7 = inlined_call_operand.vmem [shape: bf16[16,32], index: 7, kind: input, shape index: {}]   ;;  %s1000_s8 = inlined_call_operand.vmem [shape: bf16[2,32], index: 8, kind: input, shape index: {}]   ;;  %s1001_s9 = inlined_call_operand.vmem [shape: f32[1,32], index: 9, kind: input, shape index: {}]   ;;  %s1002_s10 = inlined_call_operand.vmem [shape: bf16[32,64], index: 10, kind: input, shape index: {}]   ;;  %s1003_s11 = inlined_call_operand.vmem [shape: f32[1,64], index: 11, kind: input, shape index: {}]   ;;  %s1004_s12 = inlined_call_operand.vmem [shape: bf16[64,128], index: 12, kind: input, shape index: {}]   ;;  %s1005_s13 = inlined_call_operand.vmem [shape: f32[1,128], index: 13, kind: input, shape index: {}]   ;;  %s1006_s14 = inlined_call_operand.hbm [shape: f32[2,128], index: 14, kind: output, shape index: {}]  }
   0x1   :  { %v759_v0 = vld [vmem:[%s994_s2] sm:$0xff]   ;;  %693 = vmatprep.subr.bf16.mxu0 %v799_v1  ;;  %705 = vmatprep.subr.bf16.mxu1 %v799_v1  ;;  %v760_v2 = vld [vmem:[%s994_s2 + $0x8] sm:$0xff]   ;;  %v761_v3 = vld [vmem:[%s994_s2 + $0x10] sm:$0xff]  }
   0x2   :  { %694 = vmatpush3.bf16.msra.mxu0 %v759_v0  ;;  %701 = vmatprep.mubr.msk.bf16.mxu0 %vm800_vm0, %v799_v1 }
   0x3   :  { %695 = vmatprep.subr.bf16.mxu0 %v799_v1  ;;  %707 = vmatprep.mubr.msk.bf16.mxu1 %vm800_vm0, %v799_v1 }
   0x6   :  { %696 = vmatpush3.bf16.msra.mxu0 %v760_v2 }
   0x7   :  { %697 = vmatprep.subr.bf16.mxu0 %v799_v1 }
   0x8   :  { %19 = vsyncpa [#allocation3], 0  ;;  %v762_v4 = vld [vmem:[%s994_s2 + $0x18] sm:$0xff]   ;;  %v49_v5 = vld [vmem:[%s992_s0] sm:$0xf]  ;;  %vm82_vm1 = vcmask 523264   ;;  %v216_v18 = vlaneseq }
   0x9   :  { %v763_v6 = vld [vmem:[%s995_s3] sm:$0xff]   ;;  %v801_v7 = vmov 1   ;;  %vm250_vm2 = vcmask 1043456   ;;  %vm135_vm3 = vcmask 130048   ;;  %vm227_vm5 = vcmask 64512   ;;  %v766_v60 = vld [vmem:[%s1002_s10 + $0x8] sm:$0xff]  }
   0xa   :  { %698 = vmatpush3.bf16.msra.mxu0 %v761_v3  ;;  %706 = vmatpush3.bf16.msra.mxu1 %v763_v6  ;;  %v217_v19 = vshrl.u32 %v216_v18, 7  ;;  %v221_v22 = vld [vmem:[%s993_s1] sm:$0xf]  ;;  %vm377_vm6 = vcmask 1040384   ;;  %vm373_vm7 = vcmask 15360   ;;  %v768_v62 = vld [vmem:[%s1004_s12 + $0x8] sm:$0xff]  }
   0xb   :  { %699 = vmatprep.subr.bf16.mxu0 %v799_v1  ;;  %711 = vmatprep.subr.bf16.mxu1 %v799_v1  ;;  %v222_v24 = vunpack.c.l.bf16 %v221_v22  ;;  %v764_v40 = vld [vmem:[%s999_s7] sm:$0xff]   ;;  %vm503_vm8 = vcmask 261120   ;;  %s802_s3 = smov [#allocation2]  }
   0xc   :  { %758 = vset.pattern.permute.xlu0 %v801_v7  ;;  %v218_v21 = vsub.s32 0, %v217_v19  ;;  %v653_v41 = vld [vmem:[%s996_s4] ss:$0 sm:$0xff] }
   0xd   :  { %v293_v45 = vld [vmem:[%s997_s5] sm:$0x3] }
   0xe   :  { %700 = vmatpush3.bf16.msra.mxu0 %v762_v4  ;;  %v371_v48 = vld [vmem:[%s1000_s8] sm:$0x1] }
   0xf   :  { %717 = vmatprep.subr.mxu0 %v799_v1  ;;  %v379_v49 = vsel %vm377_vm6, %v371_v48, 0  ;;  %v370_v50 = vld [vmem:[%s998_s6] sm:$0x3] }
  0x10   :  { %v372_v51 = vpack.c.bf16 %v370_v50, %v370_v50  ;;  %v765_v58 = vld [vmem:[%s1002_s10] sm:$0xff]  }
  0x11   :  { %702 = vmatmul.mubr.msk.bf16.vlgmr.msra.gmra.mrb[0].mxu0 %vm82_vm1, %v49_v5  ;;  %v767_v61 = vld [vmem:[%s1004_s12] sm:$0xff]  }
  0x12   :  { %719 = vmatprep.mubr.msk.f32.mxu0 %vm800_vm0, %v799_v1  ;;  %v659_v0 = vld [vmem:[%s1001_s9] ss:$0 sm:$0xff] }
  0xe4   :  { %v120_v8 = vpop.f32.mrb[0].mxu0 }
  0xe5   :  { %v128_v9 = vpack.c.bf16 %v120_v8, %v120_v8  ;;  %v703_v10 = vpop.f32.mrb[1].mxu0 }
  0xe6   :  { %v123_v11 = vpop.f32.mrb[2].mxu0  ;;  %v770_v10 = vld [vmem:[%s1004_s12 + $0x18] sm:$0xff]  }
  0xe7   :  { %v251_v12 = vsel %vm250_vm2, %v128_v9, 0  ;;  %v704_v13 = vpop.f32.mrb[3].mxu0  ;;  %708 = vmatmul.mubr.msk.bf16.vlgmr.msra.gmra.mrb[0].mxu1 %vm135_vm3, %v128_v9  ;;  %v769_v9 = vld [vmem:[%s1004_s12 + $0x10] sm:$0xff]   ;;  %v660_v11 = vld [vmem:[%s1003_s11] ss:$0 sm:$0xff]  ;;  %s638_s12 = sshll.u32 %s802_s3, 4  ;;  %s639_s12 = int_to_ptr.vmem [resolvable:$true] %s638_s12 }
  0xe8   :  { %712 = vmatpush3.bf16.msra.mxu1 %v251_v12  ;;  %713 = vmatprep.mubr.msk.bf16.mxu1 %vm800_vm0, %v799_v1  ;;  %s775_s11 = scalar_lea.vmem %s639_s12, 32  ;;  %p780_p1 = scmp.lt.s32.totalorder %s639_s12, %s639_s12 }
  0xe9   :  { %728 = vmatprep.subr.bf16.mxu1 %v799_v1  ;;  %p776_p0 = scmp.ne.s32.totalorder %s639_s12, %s775_s11  ;;  %p781_p2 = scmp.lt.s32.totalorder %s775_s11, %s775_s11 }
  0xeb   :  { %p782_p3 = por %p781_p2, %p780_p1 }
  0xed   :  { %p783_p4 = pnand %p782_p3, %p776_p0 }
 0x1ba   :  { %v173_v14 = vpop.f32.mrb[0].mxu1 }
 0x1bb   :  { %213 = vperm.xlu0 %758, %v173_v14   ;;  %v709_v15 = vpop.f32.mrb[1].mxu1 }
 0x1bc   :  { %v176_v16 = vpop.f32.mrb[2].mxu1 }
 0x1bd   :  { %v710_v17 = vpop.f32.mrb[3].mxu1 }
 0x1d9   :  { %179 = vxpose.xlu0.b32.start.end [1/1] (short) (narrow) %v173_v14, 8 }
 0x23a   :  { %v214_v20 = vpop.permute.xlu0 %213 }
 0x259   :  { %v195_v23 = vpop.trf.xlu0 }
 0x25a   :  { %v219_v25 = vrot.slane %v195_v23, %v218_v21 }
 0x25c   :  { %v220_v26 = vadd.f32 %v219_v25, %v214_v20 }
 0x25e   :  { %v223_v27 = vadd.f32 %v222_v24, %v220_v26 }
 0x260   :  { %vm224_vm4 = vcmp.gt.f32.partialorder %v223_v27, 0.0  ;;  %v225_v28 = vmul.f32 0.2, %v223_v27 }
 0x262   :  { %v226_v29 = vsel %vm224_vm4, %v223_v27, %v225_v28 }
 0x263   :  { %v228_v30 = vsel %vm227_vm5, %v226_v29, -inf }
 0x264   :  { %229 = vmax.xlane.f32.xlu1 %v228_v30 }
 0x2f1   :  { %v230_v31 = vpop.xlane.xlu1 %229 }
 0x2f2   :  { %v231_v32 = vsub.f32 %v226_v29, %v230_v31 }
 0x2f4   :  { %v232_v33 = vmul.f32 1.442695, %v231_v32 }
 0x2f6   :  { %771 = vpow2.f32 %v232_v33 }
 0x300   :  { %v772_v34 = vpop.eup %771 }
 0x301   :  { %v234_v35 = vsel %vm227_vm5, %v772_v34, 0.0 }
 0x302   :  { %235 = vadd.xlane.f32.xlu1 %v234_v35 }
 0x38f   :  { %v236_v36 = vpop.xlane.xlu1 %235 }
 0x390   :  { %773 = vrcp.f32 %v236_v36 }
 0x39a   :  { %v774_v37 = vpop.eup %773 }
 0x39b   :  { %v238_v38 = vmul.f32 %v774_v37, %v772_v34 }
 0x39d   :  { %v239_v39 = vpack.c.bf16 %v238_v38, %v238_v38 }
 0x39f   :  { %714 = vmatmul.mubr.msk.bf16.vlgmr.msra.gmra.mrb[4].mxu1 %vm227_vm5, %v239_v39 }
 0x3a0   :  { %730 = vmatprep.mubr.msk.bf16.mxu1 %vm800_vm0, %v799_v1  ;;  %729 = vmatpush3.bf16.msra.mxu1 %v764_v40 }
 0x3a1   :  { %742 = vmatprep.subr.bf16.mxu1 %v799_v1 }
 0x472   :  { %v287_v42 = vpop.f32.mrb[4].mxu1 }
 0x473   :  { %v288_v43 = vadd.f32 %v653_v41, %v287_v42  ;;  %v715_v44 = vpop.f32.mrb[5].mxu1 }
 0x474   :  { %v290_v46 = vpop.f32.mrb[6].mxu1 }
 0x475   :  { %v716_v47 = vpop.f32.mrb[7].mxu1  ;;  %718 = vmatpush3.msra.mxu0 %v288_v43 }
 0x476   :  { %720 = vmatmul.mubr.msk.f32.vlgmr.msra.gmra.mrb[4].mxu0 %vm227_vm5, %v293_v45  ;;  %722 = vmatprep.subr.bf16.mxu0 %v799_v1 }
 0x477   :  { %724 = vmatprep.mubr.msk.bf16.mxu0 %vm800_vm0, %v799_v1  ;;  %723 = vmatpush3.bf16.msra.mxu0 %v379_v49 }
 0x478   :  { %734 = vmatprep.subr.bf16.mxu0 %v799_v1 }
 0x47a   :  { %725 = vmatmul.mubr.msk.bf16.vlgmr.msra.gmra.mrb[8].mxu0 %vm373_vm7, %v372_v51 }
 0x47b   :  { %738 = vmatprep.mubr.msk.bf16.mxu0 %vm800_vm0, %v799_v1  ;;  %735 = vmatpush3.bf16.msra.mxu0 %v765_v58 }
 0x47c   :  { %736 = vmatprep.subr.bf16.mxu0 %v799_v1 }
 0x47f   :  { %737 = vmatpush3.bf16.msra.mxu0 %v766_v60 }
 0x549   :  { %v363_v52 = vpop.f32.mrb[4].mxu0 }
 0x54a   :  { %v369_v53 = vpack.c.bf16 %v363_v52, %v363_v52  ;;  %v721_v54 = vpop.f32.mrb[5].mxu0 }
 0x54c   :  { %731 = vmatmul.mubr.msk.bf16.vlgmr.msra.gmra.mrb[8].mxu1 %vm135_vm3, %v369_v53 }
 0x54d   :  { %750 = vmatprep.mubr.msk.bf16.mxu1 %vm800_vm0, %v799_v1  ;;  %v415_v55 = vpop.f32.mrb[8].mxu0  ;;  %743 = vmatpush3.bf16.msra.mxu1 %v767_v61 }
 0x54e   :  { %v726_v56 = vpop.f32.mrb[9].mxu0  ;;  %744 = vmatprep.subr.bf16.mxu1 %v799_v1 }
 0x54f   :  { %v418_v57 = vpop.f32.mrb[10].mxu0 }
 0x550   :  { %v727_v59 = vpop.f32.mrb[11].mxu0 }
 0x551   :  { %745 = vmatpush3.bf16.msra.mxu1 %v768_v62 }
 0x552   :  { %746 = vmatprep.subr.bf16.mxu1 %v799_v1 }
 0x555   :  { %747 = vmatpush3.bf16.msra.mxu1 %v769_v9 }
 0x556   :  { %748 = vmatprep.subr.bf16.mxu1 %v799_v1  ;;  %v664_v1 = vld [vmem:[%s1005_s13] ss:$0 sm:$0xff] }
 0x559   :  { %749 = vmatpush3.bf16.msra.mxu1 %v770_v10 }
 0x61f   :  { %v464_v63 = vpop.f32.mrb[8].mxu1 }
 0x620   :  { %v465_v2 = vadd.f32 %v464_v63, %v415_v55  ;;  %v732_v3 = vpop.f32.mrb[9].mxu1 }
 0x621   :  { %v467_v4 = vpop.f32.mrb[10].mxu1 }
 0x622   :  { %v477_v5 = vadd.f32 %v659_v0, %v465_v2  ;;  %v733_v6 = vpop.f32.mrb[11].mxu1 }
 0x624   :  { %v478_v7 = vmax.f32 %v477_v5, 0.0 }
 0x626   :  { %v483_v8 = vpack.c.bf16 %v478_v7, %v478_v7 }
 0x628   :  { %739 = vmatmul.mubr.msk.bf16.vlgmr.msra.gmra.mrb[12].mxu0 %vm503_vm8, %v483_v8 }
 0x6fb   :  { %v541_v12 = vpop.f32.mrb[12].mxu0 }
 0x6fc   :  { %v542_v13 = vadd.f32 %v660_v11, %v541_v12  ;;  %v740_v14 = vpop.f32.mrb[13].mxu0 }
 0x6fd   :  { %v544_v15 = vpop.f32.mrb[14].mxu0 }
 0x6fe   :  { %v547_v16 = vmax.f32 %v542_v13, 0.0  ;;  %v741_v17 = vpop.f32.mrb[15].mxu0 }
 0x700   :  { %v556_v18 = vpack.c.bf16 %v547_v16, %v547_v16 }
 0x702   :  { %751 = vmatmul.mubr.msk.bf16.vlgmr.msra.gmra.mrb[12].mxu1 %vm82_vm1, %v556_v18 }
 0x7d5   :  { %v625_v19 = vpop.f32.mrb[12].mxu1 }
 0x7d6   :  { %v626_v20 = vadd.f32 %v664_v1, %v625_v19  ;;  %v752_v21 = vpop.f32.mrb[13].mxu1 }
 0x7d7   :  { %v628_v22 = vpop.f32.mrb[14].mxu1 }
 0x7d8   :  { %631 = vst [vmem:[#allocation2] sm:$0x3] %v626_v20  ;;  %v753_v23 = vpop.f32.mrb[15].mxu1 }
 0x7d9   :  { %786 = shalt.err (!%p783_p4)
}
 0x7da   :  { %s787_s13 = scalar_lea.hbm %s1006_s14, 32 }
 0x7db   :  { %p788_p5 = scmp.ne.s32.totalorder %s1006_s14, %s787_s13  ;;  %p791_p6 = scmp.lt.u32.totalorder %s787_s13, %s1006_s14 }
 0x7dd   :  { %p793_p7 = pnand %p791_p6, %p788_p5 }
 0x7df   :  { %796 = shalt.err (!%p793_p7)
}
 0x7e0   :  { %641 = dma.vmem_to_hbm [thread:$0]  %s639_s12, 32, %s1006_s14, [#allocation3]  }
 0x7e1   :  { %797 = dma.done.wait [#allocation3], 32  }
 0x7e2   :  { %798 = vsyncadd [#allocation3], 4294967264 }
 0x7e3   :  { %645 = vsyncpa [#allocation3], 1 }

</bundles_post_ra>
